<compile_context>
chip_gen: v5e
topology: v5e:2x2
jax: 0.10.0
libtpu: 0.0.40
codegen_flags: <defaults>
</compile_context>

<pallas_src>
import jax
import jax.numpy as jnp
import numpy as np
from jax.experimental import pallas as pl
from jax.experimental.pallas import tpu as pltpu

# ---- model hyper-parameters (small, TPU-tile-friendly) ----------------------
BATCH = 8            # B
SEQ_LEN = 16         # S  (token sequence length)
EMBEDDING_DIM = 128  # E
NUM_FILTERS = 128    # F
FILTER_SIZES = (2, 3, 4)
NUM_CLASSES = 8      # C
LOGIT_PAD = 128      # lane-dense width of the logits slab emitted by the kernel


def _textcnn_kernel(x_ref, wc2_ref, wc3_ref, wc4_ref, bc_ref, wl_ref, bl_ref,
                    out_ref):
    B, S, E, F = BATCH, SEQ_LEN, EMBEDDING_DIM, NUM_FILTERS
    N = B * S

    # In-kernel flatten + bf16 cast (VPU work, hidden under the MXU pushes).
    xb = x_ref[...].reshape(N, E).astype(jnp.bfloat16)           # (B*S, E)

    pooled = []                                    # per-filter (B, F) features
    w_refs = (wc2_ref, wc3_ref, wc4_ref)
    for s, (k, w_ref) in enumerate(zip(FILTER_SIZES, w_refs)):
        L = S - k + 1
        # One MXU matmul per filter size, consumed immediately:
        #   (B*S, E) bf16 @ (E, k*F) bf16 -> (B*S, k*F) f32
        y = jnp.dot(xb, w_ref[...], preferred_element_type=jnp.float32)

        # conv[r] = sum_i y_i[r + i]: shift slab i up by i rows with a
        # tile-aligned sublane roll (XLU slot, co-issues with the VPU adds).
        # All lane slices are at multiples of F=128.
        conv = y[:, 0:F]
        for i in range(1, k):
            conv = conv + pltpu.roll(y[:, i * F:(i + 1) * F],
                                     shift=N - i, axis=0)

        act = jnp.maximum(conv + bc_ref[:, s * F:(s + 1) * F], 0.0)  # ReLU
        act = act.reshape(B, S, F)
        # Rows t >= L picked up cross-batch garbage from the roll wrap-around:
        # mask them out before the time max (valid max is >= 0, so -inf never
        # wins).
        t = jax.lax.broadcasted_iota(jnp.int32, (B, S, F), 1)
        act = jnp.where(t < L, act, -jnp.inf)
        pooled.append(jnp.max(act, axis=1))                      # (B, F)

    feat = jnp.concatenate(pooled, axis=1)                       # (B, 3F) f32
    # Lane-dense classifier: wl zero-padded to (3F, 128), bl to (1, 128).
    logits = jnp.dot(feat, wl_ref[...],
                     preferred_element_type=jnp.float32) + bl_ref[...]
    out_ref[...] = logits.astype(out_ref.dtype)                  # (B, 128)


def prepare_params(conv_ws, conv_bs, wl, bl):
    """One-time (init) weight preparation — NOT on the per-call path.

    conv_ws[s]: (k, E, F) f32, conv_bs[s]: (1, F) f32,
    wl: (3F, C) f32, bl: (1, C) f32.
    """
    F, C = NUM_FILTERS, NUM_CLASSES
    # Per filter size: concat the k shifted (E, F) blocks -> (E, k*F), bf16.
    wcs = tuple(
        jnp.concatenate([w[i] for i in range(w.shape[0])], axis=1)
        .astype(jnp.bfloat16)
        for w in conv_ws)
    bc = jnp.concatenate(conv_bs, axis=1)                        # (1, 3F) f32
    # Zero-pad the classifier to a lane-dense 128-wide output.
    wl_pad = jnp.zeros((len(FILTER_SIZES) * F, LOGIT_PAD),
                       jnp.float32).at[:, :C].set(wl)
    bl_pad = jnp.zeros((1, LOGIT_PAD), jnp.float32).at[:, :C].set(bl)
    return wcs + (bc, wl_pad, bl_pad)


def textcnn_forward(x, params):
    """x: (B, S, E) f32 BERT last_hidden_state.  Returns logits (B, C) f32."""
    B = x.shape[0]
    vmem = pl.BlockSpec(memory_space=pltpu.MemorySpace.VMEM)
    logits_pad = pl.pallas_call(
        _textcnn_kernel,
        out_shape=jax.ShapeDtypeStruct((B, LOGIT_PAD), jnp.float32),
        in_specs=[vmem] * (1 + len(params)),
        out_specs=vmem,
    )(x, *params)
    return logits_pad[:, :NUM_CLASSES]


# ---- pure-JAX f32 reference (for correctness check) --------------------------
def ref_forward(x, conv_ws, conv_bs, wl, bl):
    feats = []
    for w, b in zip(conv_ws, conv_bs):
        k = w.shape[0]
        L = x.shape[1] - k + 1
        outs = [jnp.einsum('bke,kef->bf', x[:, t:t + k, :], w) + b
                for t in range(L)]
        act = jax.nn.relu(jnp.stack(outs, axis=1))   # (B, L, F)
        feats.append(jnp.max(act, axis=1))           # (B, F)
    feat = jnp.concatenate(feats, axis=1)            # (B, 3F)
    return feat @ wl + bl


if __name__ == "__main__":
    key = jax.random.PRNGKey(0)
    keys = jax.random.split(key, 2 + 2 * len(FILTER_SIZES) + 2)

    # "BERT output": deterministic synthetic last_hidden_state
    x = jax.random.normal(keys[0], (BATCH, SEQ_LEN, EMBEDDING_DIM),
                          dtype=jnp.float32)

    conv_ws, conv_bs = [], []
    for i, k in enumerate(FILTER_SIZES):
        conv_ws.append(0.05 * jax.random.normal(
            keys[1 + 2 * i], (k, EMBEDDING_DIM, NUM_FILTERS), dtype=jnp.float32))
        conv_bs.append(0.01 * jax.random.normal(
            keys[2 + 2 * i], (1, NUM_FILTERS), dtype=jnp.float32))

    wl = 0.05 * jax.random.normal(
        keys[-2], (NUM_FILTERS * len(FILTER_SIZES), NUM_CLASSES),
        dtype=jnp.float32)
    bl = 0.01 * jax.random.normal(keys[-1], (1, NUM_CLASSES), dtype=jnp.float32)

    # Weight fusion / padding happens once at init (weights are frozen).
    params = prepare_params(conv_ws, conv_bs, wl, bl)
    params = jax.block_until_ready(params)

    fwd = jax.jit(textcnn_forward)
    out = fwd(x, params)
    out = jax.block_until_ready(out)

    ref = ref_forward(x, conv_ws, conv_bs, wl, bl)
    # bf16 MXU operands (f32 accumulation) -> looser tolerance than pure f32.
    np.testing.assert_allclose(np.asarray(out), np.asarray(ref),
                               rtol=2e-2, atol=2e-2)
    print("KERNEL_OK")
</pallas_src>

<mosaic_0001>
module attributes {stable_mosaic.version = 11 : i64} {
  func.func @_textcnn_kernel(%arg0: memref<8x16x128xf32, #tpu.memory_space<vmem>>, %arg1: memref<128x256xbf16, #tpu.memory_space<vmem>>, %arg2: memref<128x384xbf16, #tpu.memory_space<vmem>>, %arg3: memref<128x512xbf16, #tpu.memory_space<vmem>>, %arg4: memref<1x384xf32, #tpu.memory_space<vmem>>, %arg5: memref<384x128xf32, #tpu.memory_space<vmem>>, %arg6: memref<1x128xf32, #tpu.memory_space<vmem>>, %arg7: memref<8x128xf32, #tpu.memory_space<vmem>>) attributes {dimension_semantics = [], scalar_prefetch = 0 : i64, scratch_operands = 0 : i64, tpu.core_type = #tpu.core_type<tc>} {
    %c0 = arith.constant 0 : index
    %c0_0 = arith.constant 0 : index
    %c0_1 = arith.constant 0 : index
    %0 = vector.load %arg0[%c0, %c0_0, %c0_1] : memref<8x16x128xf32, #tpu.memory_space<vmem>>, vector<8x16x128xf32>
    %1 = vector.shape_cast %0 : vector<8x16x128xf32> to vector<128x128xf32>
    %2 = arith.truncf %1 : vector<128x128xf32> to vector<128x128xbf16>
    %c0_2 = arith.constant 0 : index
    %c0_3 = arith.constant 0 : index
    %3 = vector.load %arg1[%c0_2, %c0_3] : memref<128x256xbf16, #tpu.memory_space<vmem>>, vector<128x256xbf16>
    %cst = arith.constant dense<0.000000e+00> : vector<128x256xf32>
    %4 = tpu.matmul %2, %3, %cst {dimension_numbers = #tpu.dot_dimension_numbers<[1], [0], [0], [1], [0, 0, 1, 1], [], []>} : vector<128x128xbf16>, vector<128x256xbf16>, vector<128x256xf32> -> vector<128x256xf32>
    %5 = vector.extract_strided_slice %4 {offsets = [0, 0], sizes = [128, 128], strides = [1, 1]} : vector<128x256xf32> to vector<128x128xf32>
    %6 = vector.extract_strided_slice %4 {offsets = [0, 128], sizes = [128, 128], strides = [1, 1]} : vector<128x256xf32> to vector<128x128xf32>
    %c127_i32 = arith.constant 127 : i32
    %7 = tpu.dynamic_rotate %6 by %c127_i32 dim 0 : vector<128x128xf32>, i32 -> vector<128x128xf32>
    %8 = arith.addf %5, %7 : vector<128x128xf32>
    %c0_4 = arith.constant 0 : index
    %c0_5 = arith.constant 0 : index
    %9 = vector.load %arg4[%c0_4, %c0_5] : memref<1x384xf32, #tpu.memory_space<vmem>>, vector<1x128xf32>
    %10 = vector.broadcast %9 : vector<1x128xf32> to vector<128x128xf32>
    %11 = arith.addf %8, %10 : vector<128x128xf32>
    %cst_6 = arith.constant 0.000000e+00 : f32
    %12 = vector.broadcast %cst_6 : f32 to vector<128x128xf32>
    %13 = arith.maximumf %11, %12 : vector<128x128xf32>
    %14 = vector.shape_cast %13 : vector<128x128xf32> to vector<8x16x128xf32>
    %15 = tpu.iota {dimensions = array<i32: 1>} : vector<8x16x128xi32>
    %c15_i32 = arith.constant 15 : i32
    %16 = vector.broadcast %c15_i32 : i32 to vector<8x16x128xi32>
    %17 = arith.cmpi slt, %15, %16 : vector<8x16x128xi32>
    %cst_7 = arith.constant 0xFF800000 : f32
    %18 = vector.broadcast %cst_7 : f32 to vector<8x16x128xf32>
    %19 = arith.select %17, %14, %18 : vector<8x16x128xi1>, vector<8x16x128xf32>
    %cst_8 = arith.constant dense<0xFF800000> : vector<8x128xf32>
    %20 = vector.multi_reduction <maximumf>, %19, %cst_8 [1] : vector<8x16x128xf32> to vector<8x128xf32>
    %c0_9 = arith.constant 0 : index
    %c0_10 = arith.constant 0 : index
    %21 = vector.load %arg2[%c0_9, %c0_10] : memref<128x384xbf16, #tpu.memory_space<vmem>>, vector<128x384xbf16>
    %cst_11 = arith.constant dense<0.000000e+00> : vector<128x384xf32>
    %22 = tpu.matmul %2, %21, %cst_11 {dimension_numbers = #tpu.dot_dimension_numbers<[1], [0], [0], [1], [0, 0, 1, 1], [], []>} : vector<128x128xbf16>, vector<128x384xbf16>, vector<128x384xf32> -> vector<128x384xf32>
    %23 = vector.extract_strided_slice %22 {offsets = [0, 0], sizes = [128, 128], strides = [1, 1]} : vector<128x384xf32> to vector<128x128xf32>
    %24 = vector.extract_strided_slice %22 {offsets = [0, 128], sizes = [128, 128], strides = [1, 1]} : vector<128x384xf32> to vector<128x128xf32>
    %c127_i32_12 = arith.constant 127 : i32
    %25 = tpu.dynamic_rotate %24 by %c127_i32_12 dim 0 : vector<128x128xf32>, i32 -> vector<128x128xf32>
    %26 = arith.addf %23, %25 : vector<128x128xf32>
    %27 = vector.extract_strided_slice %22 {offsets = [0, 256], sizes = [128, 128], strides = [1, 1]} : vector<128x384xf32> to vector<128x128xf32>
    %c126_i32 = arith.constant 126 : i32
    %28 = tpu.dynamic_rotate %27 by %c126_i32 dim 0 : vector<128x128xf32>, i32 -> vector<128x128xf32>
    %29 = arith.addf %26, %28 : vector<128x128xf32>
    %c0_13 = arith.constant 0 : index
    %c128 = arith.constant 128 : index
    %30 = vector.load %arg4[%c0_13, %c128] : memref<1x384xf32, #tpu.memory_space<vmem>>, vector<1x128xf32>
    %31 = vector.broadcast %30 : vector<1x128xf32> to vector<128x128xf32>
    %32 = arith.addf %29, %31 : vector<128x128xf32>
    %cst_14 = arith.constant 0.000000e+00 : f32
    %33 = vector.broadcast %cst_14 : f32 to vector<128x128xf32>
    %34 = arith.maximumf %32, %33 : vector<128x128xf32>
    %35 = vector.shape_cast %34 : vector<128x128xf32> to vector<8x16x128xf32>
    %36 = tpu.iota {dimensions = array<i32: 1>} : vector<8x16x128xi32>
    %c14_i32 = arith.constant 14 : i32
    %37 = vector.broadcast %c14_i32 : i32 to vector<8x16x128xi32>
    %38 = arith.cmpi slt, %36, %37 : vector<8x16x128xi32>
    %cst_15 = arith.constant 0xFF800000 : f32
    %39 = vector.broadcast %cst_15 : f32 to vector<8x16x128xf32>
    %40 = arith.select %38, %35, %39 : vector<8x16x128xi1>, vector<8x16x128xf32>
    %cst_16 = arith.constant dense<0xFF800000> : vector<8x128xf32>
    %41 = vector.multi_reduction <maximumf>, %40, %cst_16 [1] : vector<8x16x128xf32> to vector<8x128xf32>
    %c0_17 = arith.constant 0 : index
    %c0_18 = arith.constant 0 : index
    %42 = vector.load %arg3[%c0_17, %c0_18] : memref<128x512xbf16, #tpu.memory_space<vmem>>, vector<128x512xbf16>
    %cst_19 = arith.constant dense<0.000000e+00> : vector<128x512xf32>
    %43 = tpu.matmul %2, %42, %cst_19 {dimension_numbers = #tpu.dot_dimension_numbers<[1], [0], [0], [1], [0, 0, 1, 1], [], []>} : vector<128x128xbf16>, vector<128x512xbf16>, vector<128x512xf32> -> vector<128x512xf32>
    %44 = vector.extract_strided_slice %43 {offsets = [0, 0], sizes = [128, 128], strides = [1, 1]} : vector<128x512xf32> to vector<128x128xf32>
    %45 = vector.extract_strided_slice %43 {offsets = [0, 128], sizes = [128, 128], strides = [1, 1]} : vector<128x512xf32> to vector<128x128xf32>
    %c127_i32_20 = arith.constant 127 : i32
    %46 = tpu.dynamic_rotate %45 by %c127_i32_20 dim 0 : vector<128x128xf32>, i32 -> vector<128x128xf32>
    %47 = arith.addf %44, %46 : vector<128x128xf32>
    %48 = vector.extract_strided_slice %43 {offsets = [0, 256], sizes = [128, 128], strides = [1, 1]} : vector<128x512xf32> to vector<128x128xf32>
    %c126_i32_21 = arith.constant 126 : i32
    %49 = tpu.dynamic_rotate %48 by %c126_i32_21 dim 0 : vector<128x128xf32>, i32 -> vector<128x128xf32>
    %50 = arith.addf %47, %49 : vector<128x128xf32>
    %51 = vector.extract_strided_slice %43 {offsets = [0, 384], sizes = [128, 128], strides = [1, 1]} : vector<128x512xf32> to vector<128x128xf32>
    %c125_i32 = arith.constant 125 : i32
    %52 = tpu.dynamic_rotate %51 by %c125_i32 dim 0 : vector<128x128xf32>, i32 -> vector<128x128xf32>
    %53 = arith.addf %50, %52 : vector<128x128xf32>
    %c0_22 = arith.constant 0 : index
    %c256 = arith.constant 256 : index
    %54 = vector.load %arg4[%c0_22, %c256] : memref<1x384xf32, #tpu.memory_space<vmem>>, vector<1x128xf32>
    %55 = vector.broadcast %54 : vector<1x128xf32> to vector<128x128xf32>
    %56 = arith.addf %53, %55 : vector<128x128xf32>
    %cst_23 = arith.constant 0.000000e+00 : f32
    %57 = vector.broadcast %cst_23 : f32 to vector<128x128xf32>
    %58 = arith.maximumf %56, %57 : vector<128x128xf32>
    %59 = vector.shape_cast %58 : vector<128x128xf32> to vector<8x16x128xf32>
    %60 = tpu.iota {dimensions = array<i32: 1>} : vector<8x16x128xi32>
    %c13_i32 = arith.constant 13 : i32
    %61 = vector.broadcast %c13_i32 : i32 to vector<8x16x128xi32>
    %62 = arith.cmpi slt, %60, %61 : vector<8x16x128xi32>
    %cst_24 = arith.constant 0xFF800000 : f32
    %63 = vector.broadcast %cst_24 : f32 to vector<8x16x128xf32>
    %64 = arith.select %62, %59, %63 : vector<8x16x128xi1>, vector<8x16x128xf32>
    %cst_25 = arith.constant dense<0xFF800000> : vector<8x128xf32>
    %65 = vector.multi_reduction <maximumf>, %64, %cst_25 [1] : vector<8x16x128xf32> to vector<8x128xf32>
    %66 = tpu.concatenate %20, %41, %65 in 1 : vector<8x128xf32>, vector<8x128xf32>, vector<8x128xf32> -> vector<8x384xf32>
    %c0_26 = arith.constant 0 : index
    %c0_27 = arith.constant 0 : index
    %67 = vector.load %arg5[%c0_26, %c0_27] : memref<384x128xf32, #tpu.memory_space<vmem>>, vector<384x128xf32>
    %cst_28 = arith.constant dense<0.000000e+00> : vector<8x128xf32>
    %68 = tpu.matmul %66, %67, %cst_28 {dimension_numbers = #tpu.dot_dimension_numbers<[1], [0], [0], [1], [0, 0, 1, 1], [], []>} : vector<8x384xf32>, vector<384x128xf32>, vector<8x128xf32> -> vector<8x128xf32>
    %c0_29 = arith.constant 0 : index
    %c0_30 = arith.constant 0 : index
    %69 = vector.load %arg6[%c0_29, %c0_30] : memref<1x128xf32, #tpu.memory_space<vmem>>, vector<1x128xf32>
    %70 = vector.broadcast %69 : vector<1x128xf32> to vector<8x128xf32>
    %71 = arith.addf %68, %70 : vector<8x128xf32>
    %c0_31 = arith.constant 0 : index
    %c0_32 = arith.constant 0 : index
    %72 = vector.load %arg7[%c0_31, %c0_32] : memref<8x128xf32, #tpu.memory_space<vmem>>, vector<8x128xf32>
    tpu.vector_store %arg7[%c0_31, %c0_32], %71 {strides = array<i32>} : memref<8x128xf32, #tpu.memory_space<vmem>>, vector<8x128xf32>,
    return
  }
}

</mosaic_0001>

<bundles_post_ra>
// kernel: textcnn_forward.1
= control target key start
LH: loop header
LB: loop body
LE: loop exit
PB: predicated region body
PF: predicated region fallthrough
CT: control target
= control target key end

     0   :  { %12 = vsyncpa [#allocation3], 0  ;;  %s3101_s0 = inlined_call_operand.hbm [shape: f32[8,16,128], index: 0, kind: input, shape index: {}]   ;;  %s3102_s1 = inlined_call_operand.hbm [shape: bf16[128,256], index: 1, kind: input, shape index: {}]   ;;  %s3103_s2 = inlined_call_operand.hbm [shape: bf16[128,384], index: 2, kind: input, shape index: {}]   ;;  %s3104_s3 = inlined_call_operand.hbm [shape: bf16[128,512], index: 3, kind: input, shape index: {}]   ;;  %s3105_s4 = inlined_call_operand.vmem [shape: f32[1,384], index: 4, kind: input, shape index: {}]   ;;  %s3106_s5 = inlined_call_operand.hbm [shape: f32[384,128], index: 5, kind: input, shape index: {}]   ;;  %s3107_s6 = inlined_call_operand.vmem [shape: f32[1,128], index: 6, kind: input, shape index: {}]   ;;  %s3108_s7 = inlined_call_operand.hbm [shape: f32[8,128], index: 7, kind: output, shape index: {}]  }
   0x1   :  { %13 = vsyncpa [#allocation6], 0 }
   0x2   :  { %14 = vsyncpa [#allocation9], 0 }
   0x3   :  { %15 = vsyncpa [#allocation4], 0  ;;  %s33_s26 = sshll.u32 %s3102_s1, 4  ;;  %s2381_s27 = smov [#allocation5]   ;;  %s34_s26 = int_to_ptr.hbm [resolvable:$true] %s33_s26 }
   0x4   :  { %s35_s28 = sshll.u32 %s2381_s27, 4  ;;  %s59_s8 = sshll.u32 %s3104_s3, 4  ;;  %s36_s28 = int_to_ptr.vmem [resolvable:$true] %s35_s28  ;;  %s60_s8 = int_to_ptr.hbm [resolvable:$true] %s59_s8 }
   0x5   :  { %s2382_s9 = smov 128   ;;  %s2383_s10 = smov 8  }
   0x6   :  { %41 = dma.hbm_to_vmem [thread:$0]  %s34_s26, 2048, %s36_s28, [#allocation6], %s2382_s9, %s2382_s9, %s2383_s10  }
   0x7   :  { %s2384_s11 = smov [#allocation8]   ;;  %s2385_s13 = smov 256  }
   0x8   :  { %s61_s12 = sshll.u32 %s2384_s11, 4  ;;  %s2386_s1 = smov 16   ;;  %s62_s12 = int_to_ptr.vmem [resolvable:$true] %s61_s12 }
   0x9   :  { %67 = dma.hbm_to_vmem [thread:$0]  %s60_s8, 4096, %s62_s12, [#allocation9], %s2385_s13, %s2385_s13, %s2386_s1  }
   0xa   :  { %s20_s16 = sshll.u32 %s3101_s0, 4  ;;  %s2387_s17 = smov [#allocation2]   ;;  %s21_s16 = int_to_ptr.hbm [resolvable:$true] %s20_s16 }
   0xb   :  { %s22_s3 = sshll.u32 %s2387_s17, 4  ;;  %s46_s20 = sshll.u32 %s3103_s2, 4  ;;  %s23_s3 = int_to_ptr.vmem [resolvable:$true] %s22_s3  ;;  %s47_s20 = int_to_ptr.hbm [resolvable:$true] %s46_s20 }
   0xc   :  { %28 = dma.hbm_to_vmem [thread:$0]  %s21_s16, 2048, %s23_s3, [#allocation3], %s2382_s9, %s2382_s9, %s2383_s10  }
   0xd   :  { %s2388_s21 = smov [#allocation7]   ;;  %s2389_s23 = smov 192  }
   0xe   :  { %s48_s22 = sshll.u32 %s2388_s21, 4  ;;  %s2390_s24 = smov 12   ;;  %s49_s22 = int_to_ptr.vmem [resolvable:$true] %s48_s22 }
   0xf   :  { %54 = dma.hbm_to_vmem [thread:$0]  %s47_s20, 3072, %s49_s22, [#allocation6], %s2389_s23, %s2389_s23, %s2390_s24  }
  0x10   :  { %s74_s26 = sshll.u32 %s3106_s5, 4  ;;  %s2391_s27 = smov [#allocation10]   ;;  %s75_s26 = int_to_ptr.hbm [resolvable:$true] %s74_s26 }
  0x11   :  { %s76_s28 = sshll.u32 %s2391_s27, 4  ;;  %s77_s28 = int_to_ptr.vmem [resolvable:$true] %s76_s28 }
  0x12   :  { %82 = dma.hbm_to_vmem [thread:$0]  %s75_s26, 6144, %s77_s28, [#allocation9], %s2382_s9, %s2382_s9, %s2383_s10  }
  0x13   :  { %2373 = dma.done.wait [#allocation3], 2048  }
  0x14   :  { %2374 = vsyncadd [#allocation3], 4294965248 }
  0x15   :  { %2375 = dma.done.wait [#allocation6], 5120  }
  0x16   :  { %2376 = vsyncadd [#allocation6], 4294962176 }
  0x17   :  { %2377 = dma.done.wait [#allocation9], 10240  }
  0x18   :  { %2378 = vsyncadd [#allocation9], 4294957056  ;;  %v1887_v0 = vld [vmem:[#allocation5 + $0x70] sm:$0xf]  ;;  %v2132_v1 = vld [vmem:[#allocation5 + $0x74] sm:$0xf0] }
  0x19   :  { %v1879_v2 = vld [vmem:[#allocation5 + $0x60] sm:$0xf]  ;;  %v1888_v3 = vor.u32 %v2132_v1, %v1887_v0  ;;  %v2130_v4 = vld [vmem:[#allocation5 + $0x64] sm:$0xf0]  ;;  %v1871_v6 = vld [vmem:[#allocation5 + $0x50] sm:$0xf] }
  0x1a   :  { %v1880_v5 = vor.u32 %v2130_v4, %v1879_v2  ;;  %v2128_v7 = vld [vmem:[#allocation5 + $0x54] sm:$0xf0]  ;;  %v1863_v9 = vld [vmem:[#allocation5 + $0x40] sm:$0xf]  ;;  %v2126_v10 = vld [vmem:[#allocation5 + $0x44] sm:$0xf0] }
  0x1b   :  { %225 = vmatpush.bf16.msra.mxu0 %v1888_v3  ;;  %2189 = vmatpush.bf16.msra.mxu1 %v1888_v3  ;;  %v1872_v8 = vor.u32 %v2128_v7, %v1871_v6  ;;  %v1864_v11 = vor.u32 %v2126_v10, %v1863_v9  ;;  %v1855_v12 = vld [vmem:[#allocation5 + $0x30] sm:$0xf]  ;;  %v2124_v13 = vld [vmem:[#allocation5 + $0x34] sm:$0xf0]  ;;  %v1847_v15 = vld [vmem:[#allocation5 + $0x20] sm:$0xf] }
  0x1c   :  { %2190 = vmatpush.bf16.msra.mxu2 %v1888_v3  ;;  %2191 = vmatpush.bf16.msra.mxu3 %v1888_v3  ;;  %v1856_v14 = vor.u32 %v2124_v13, %v1855_v12  ;;  %v2122_v16 = vld [vmem:[#allocation5 + $0x24] sm:$0xf0]  ;;  %v1839_v18 = vld [vmem:[#allocation5 + $0x10] sm:$0xf]  ;;  %v2120_v19 = vld [vmem:[#allocation5 + $0x14] sm:$0xf0] }
  0x1d   :  { %v1848_v17 = vor.u32 %v2122_v16, %v1847_v15  ;;  %v1840_v20 = vor.u32 %v2120_v19, %v1839_v18  ;;  %v1831_v21 = vld [vmem:[#allocation5] sm:$0xf]  ;;  %v2118_v22 = vld [vmem:[#allocation5 + $0x4] sm:$0xf0]  ;;  %v2154_v23 = vld [vmem:[#allocation7 + $0xac] sm:$0xf] }
  0x1e   :  { %v1981_v24 = vld [vmem:[#allocation7 + $0xb4] sm:$0xf0]  ;;  %v105_v25 = vld [vmem:[#allocation2] sm:$0xff]  ;;  %v106_v26 = vld [vmem:[#allocation2 + $0x8] sm:$0xff]  ;;  %v1832_v34 = vor.u32 %v2118_v22, %v1831_v21  ;;  %vm1650_vm4 = vcmask 1041409   ;;  %vm1652_vm5 = vcmask 1042434  }
  0x1f   :  { %226 = vmatpush.bf16.msra.mxu0 %v1880_v5  ;;  %2192 = vmatpush.bf16.msra.mxu1 %v1880_v5  ;;  %v111_v27 = vld [vmem:[#allocation2 + $0x30] sm:$0xff]  ;;  %v112_v28 = vld [vmem:[#allocation2 + $0x38] sm:$0xff]  ;;  %v1979_v36 = vld [vmem:[#allocation7 + $0xa8] sm:$0xf]  ;;  %v1984_v39 = vor.u32 %v2154_v23, %v1981_v24  ;;  %v2457_v44 = vpack.c.bf16 %v106_v26, %v105_v25  ;;  %vm1654_vm6 = vcmask 1043459   ;;  %vm1656_vm7 = vcmask 1044484  }
  0x20   :  { %2193 = vmatpush.bf16.msra.mxu2 %v1880_v5  ;;  %2194 = vmatpush.bf16.msra.mxu3 %v1880_v5  ;;  %v115_v29 = vld [vmem:[#allocation2 + $0x50] sm:$0xff]  ;;  %v116_v30 = vld [vmem:[#allocation2 + $0x58] sm:$0xff]  ;;  %v1969_v41 = vld [vmem:[#allocation7 + $0x9c] sm:$0xf0]  ;;  %v2459_v45 = vpack.c.bf16 %v112_v28, %v111_v27  ;;  %vm1658_vm8 = vcmask 1045509   ;;  %vm1660_vm9 = vcmask 1046534  }
  0x21   :  { %v1987_v31 = vld [vmem:[#allocation7 + $0xb0] sm:$0xf]  ;;  %v2156_v32 = vld [vmem:[#allocation7 + $0xb8] sm:$0xf0]  ;;  %v2131_v33 = vld [vmem:[#allocation5 + $0x74] sm:$0xf]  ;;  %v2461_v48 = vpack.c.bf16 %v116_v30, %v115_v29 }
  0x22   :  { %v1889_v35 = vld [vmem:[#allocation5 + $0x78] sm:$0xf0]  ;;  %v2155_v37 = vld [vmem:[#allocation7 + $0xb0] sm:$0xf0]  ;;  %v1988_v40 = vor.u32 %v2156_v32, %v1987_v31  ;;  %v1975_v46 = vld [vmem:[#allocation7 + $0x98] sm:$0xf] }
  0x23   :  { %227 = vmatpush.bf16.msra.mxu0 %v1872_v8  ;;  %2195 = vmatpush.bf16.msra.mxu1 %v1872_v8  ;;  %v2151_v38 = vld [vmem:[#allocation7 + $0x94] sm:$0xf]  ;;  %v120_v43 = vld [vmem:[#allocation2 + $0x78] sm:$0xff]  ;;  %v2153_v47 = vld [vmem:[#allocation7 + $0xa0] sm:$0xf0]  ;;  %v1892_v49 = vor.u32 %v2131_v33, %v1889_v35  ;;  %v1980_v50 = vor.u32 %v2155_v37, %v1979_v36  ;;  %vm1662_vm10 = vcmask 1047559  }
  0x24   :  { %2196 = vmatpush.bf16.msra.mxu2 %v1872_v8  ;;  %2197 = vmatpush.bf16.msra.mxu3 %v1872_v8  ;;  %v119_v42 = vld [vmem:[#allocation2 + $0x70] sm:$0xff]  ;;  %v2129_v51 = vld [vmem:[#allocation5 + $0x64] sm:$0xf]  ;;  %v1881_v52 = vld [vmem:[#allocation5 + $0x68] sm:$0xf0]  ;;  %v1972_v54 = vor.u32 %v2151_v38, %v1969_v41  ;;  %v1976_v58 = vor.u32 %v2153_v47, %v1975_v46  ;;  %s2392_s11 = smov [#allocation11]  }
  0x25   :  { %v2463_v53 = vpack.c.bf16 %v120_v43, %v119_v42  ;;  %v1967_v55 = vld [vmem:[#allocation7 + $0x90] sm:$0xf]  ;;  %v2152_v56 = vld [vmem:[#allocation7 + $0x98] sm:$0xf0]  ;;  %v1957_v59 = vld [vmem:[#allocation7 + $0x84] sm:$0xf0]  ;;  %v1884_v62 = vor.u32 %v2129_v51, %v1881_v52 }
  0x26   :  { %v2148_v57 = vld [vmem:[#allocation7 + $0x7c] sm:$0xf]  ;;  %v1963_v60 = vld [vmem:[#allocation7 + $0x80] sm:$0xf]  ;;  %v2150_v61 = vld [vmem:[#allocation7 + $0x88] sm:$0xf0]  ;;  %v1968_v63 = vor.u32 %v2152_v56, %v1967_v55 }
  0x27   :  { %228 = vmatpush.bf16.msra.mxu0 %v1864_v11  ;;  %2198 = vmatpush.bf16.msra.mxu1 %v1864_v11  ;;  %v2127_v0 = vld [vmem:[#allocation5 + $0x54] sm:$0xf]  ;;  %v1873_v1 = vld [vmem:[#allocation5 + $0x58] sm:$0xf0]  ;;  %v1960_v2 = vor.u32 %v2148_v57, %v1957_v59  ;;  %v1955_v3 = vld [vmem:[#allocation7 + $0x78] sm:$0xf]  ;;  %v1964_v6 = vor.u32 %v2150_v61, %v1963_v60 }
  0x28   :  { %2199 = vmatpush.bf16.msra.mxu2 %v1864_v11  ;;  %2200 = vmatpush.bf16.msra.mxu3 %v1864_v11  ;;  %v2149_v4 = vld [vmem:[#allocation7 + $0x80] sm:$0xf0]  ;;  %v1945_v7 = vld [vmem:[#allocation7 + $0x6c] sm:$0xf0]  ;;  %v1951_v8 = vld [vmem:[#allocation7 + $0x68] sm:$0xf]  ;;  %v1876_v10 = vor.u32 %v2127_v0, %v1873_v1 }
  0x29   :  { %v2145_v5 = vld [vmem:[#allocation7 + $0x64] sm:$0xf]  ;;  %v2147_v9 = vld [vmem:[#allocation7 + $0x70] sm:$0xf0]  ;;  %v1956_v12 = vor.u32 %v2149_v4, %v1955_v3  ;;  %v1865_v13 = vld [vmem:[#allocation5 + $0x48] sm:$0xf0] }
  0x2a   :  { %v2125_v11 = vld [vmem:[#allocation5 + $0x44] sm:$0xf]  ;;  %v2146_v15 = vld [vmem:[#allocation7 + $0x68] sm:$0xf0]  ;;  %v1948_v16 = vor.u32 %v2145_v5, %v1945_v7  ;;  %v1933_v18 = vld [vmem:[#allocation7 + $0x54] sm:$0xf0] }
  0x2b   :  { %229 = vmatpush.bf16.msra.mxu0 %v1856_v14  ;;  %2201 = vmatpush.bf16.msra.mxu1 %v1856_v14  ;;  %v107_v19 = vld [vmem:[#allocation2 + $0x10] sm:$0xff]  ;;  %v108_v21 = vld [vmem:[#allocation2 + $0x18] sm:$0xff]  ;;  %v1868_v24 = vor.u32 %v2125_v11, %v1865_v13  ;;  %v113_v25 = vld [vmem:[#allocation2 + $0x40] sm:$0xff]  ;;  %s1815_s12 = sshll.u32 %s2392_s11, 4  ;;  %s1817_s14 = sshll.u32 %s3108_s7, 4  ;;  %s1816_s12 = int_to_ptr.vmem [resolvable:$true] %s1815_s12  ;;  %s1818_s14 = int_to_ptr.hbm [resolvable:$true] %s1817_s14 }
  0x2c   :  { %2202 = vmatpush.bf16.msra.mxu2 %v1856_v14  ;;  %2203 = vmatpush.bf16.msra.mxu3 %v1856_v14  ;;  %v1943_v14 = vld [vmem:[#allocation7 + $0x60] sm:$0xf]  ;;  %v1939_v22 = vld [vmem:[#allocation7 + $0x50] sm:$0xf]  ;;  %v2144_v23 = vld [vmem:[#allocation7 + $0x58] sm:$0xf0]  ;;  %v2469_v37 = vpack.c.bf16 %v108_v21, %v107_v19 }
  0x2d   :  { %v114_v26 = vld [vmem:[#allocation2 + $0x48] sm:$0xff]  ;;  %v117_v27 = vld [vmem:[#allocation2 + $0x60] sm:$0xff]  ;;  %v1944_v28 = vor.u32 %v2146_v15, %v1943_v14  ;;  %v2123_v30 = vld [vmem:[#allocation5 + $0x34] sm:$0xf]  ;;  %v1940_v36 = vor.u32 %v2144_v23, %v1939_v22 }
  0x2e   :  { %v118_v29 = vld [vmem:[#allocation2 + $0x68] sm:$0xff]  ;;  %v1857_v31 = vld [vmem:[#allocation5 + $0x38] sm:$0xf0]  ;;  %v2139_v35 = vld [vmem:[#allocation7 + $0x34] sm:$0xf]  ;;  %v2471_v38 = vpack.c.bf16 %v114_v26, %v113_v25 }
  0x2f   :  { %230 = vmatpush.bf16.msra.mxu0 %v1848_v17  ;;  %2204 = vmatpush.bf16.msra.mxu1 %v1848_v17  ;;  %v1931_v33 = vld [vmem:[#allocation7 + $0x48] sm:$0xf]  ;;  %v2141_v41 = vld [vmem:[#allocation7 + $0x40] sm:$0xf0]  ;;  %v2473_v42 = vpack.c.bf16 %v118_v29, %v117_v27  ;;  %v1860_v43 = vor.u32 %v2123_v30, %v1857_v31  ;;  %v1919_v51 = vld [vmem:[#allocation7 + $0x30] sm:$0xf] }
  0x30   :  { %2205 = vmatpush.bf16.msra.mxu2 %v1848_v17  ;;  %2206 = vmatpush.bf16.msra.mxu3 %v1848_v17  ;;  %v2142_v17 = vld [vmem:[#allocation7 + $0x4c] sm:$0xf]  ;;  %v2121_v47 = vld [vmem:[#allocation5 + $0x24] sm:$0xf]  ;;  %v2140_v52 = vld [vmem:[#allocation7 + $0x38] sm:$0xf0] }
  0x31   :  { %v1936_v32 = vor.u32 %v2142_v17, %v1933_v18  ;;  %v1909_v56 = vld [vmem:[#allocation7 + $0x24] sm:$0xf0]  ;;  %v1915_v57 = vld [vmem:[#allocation7 + $0x20] sm:$0xf]  ;;  %v1920_v60 = vor.u32 %v2140_v52, %v1919_v51  ;;  %v2119_v61 = vld [vmem:[#allocation5 + $0x14] sm:$0xf] }
  0x32   :  { %v2137_v1 = vld [vmem:[#allocation7 + $0x20] sm:$0xf0]  ;;  %v1897_v3 = vld [vmem:[#allocation7 + $0xc] sm:$0xf0]  ;;  %v2111_v5 = vld [vmem:[#allocation8 + $0xe8] sm:$0xf] }
  0x33   :  { %231 = vmatpush.bf16.msra.mxu0 %v1840_v20  ;;  %2207 = vmatpush.bf16.msra.mxu1 %v1840_v20  ;;  %v2135_v7 = vld [vmem:[#allocation7 + $0x10] sm:$0xf0]  ;;  %v2113_v11 = vld [vmem:[#allocation8 + $0xf8] sm:$0xf0]  ;;  %v2117_v13 = vld [vmem:[#allocation5 + $0x4] sm:$0xf] }
  0x34   :  { %2208 = vmatpush.bf16.msra.mxu2 %v1840_v20  ;;  %2209 = vmatpush.bf16.msra.mxu3 %v1840_v20  ;;  %v1952_v20 = vor.u32 %v2147_v9, %v1951_v8  ;;  %v2188_v9 = vld [vmem:[#allocation8 + $0xf4] sm:$0xf0]  ;;  %v1833_v14 = vld [vmem:[#allocation5 + $0x8] sm:$0xf0]  ;;  %v2185_v18 = vld [vmem:[#allocation8 + $0xe4] sm:$0xf] }
  0x35   :  { %v2134_v17 = vld [vmem:[#allocation7 + $0x8] sm:$0xf0]  ;;  %v2112_v21 = vor.u32 %v2188_v9, %v2111_v5  ;;  %v2103_v22 = vld [vmem:[#allocation8 + $0xe0] sm:$0xf]  ;;  %v2187_v23 = vld [vmem:[#allocation8 + $0xec] sm:$0xf0]  ;;  %v1836_v25 = vor.u32 %v2117_v13, %v1833_v14 }
  0x36   :  { %v109_v26 = vld [vmem:[#allocation2 + $0x20] sm:$0xff]  ;;  %v110_v27 = vld [vmem:[#allocation2 + $0x28] sm:$0xff]  ;;  %v2184_v30 = vld [vmem:[#allocation8 + $0xd4] sm:$0xf0] }
  0x37   :  { %232 = vmatpush.bf16.msra.mxu0 %v1832_v34  ;;  %2210 = vmatpush.bf16.msra.mxu1 %v1832_v34  ;;  %v2095_v29 = vld [vmem:[#allocation8 + $0xc8] sm:$0xf]  ;;  %v2073_v51 = vld [vmem:[#allocation8 + $0xb0] sm:$0xf0]  ;;  %v2055_v5 = vld [vmem:[#allocation8 + $0x80] sm:$0xf] }
  0x38   :  { %2211 = vmatpush.bf16.msra.mxu2 %v1832_v34  ;;  %2212 = vmatpush.bf16.msra.mxu3 %v1832_v34  ;;  %v2143_v34 = vld [vmem:[#allocation7 + $0x50] sm:$0xf0]  ;;  %v2079_v52 = vld [vmem:[#allocation8 + $0xa8] sm:$0xf]  ;;  %v2065_v9 = vld [vmem:[#allocation8 + $0x98] sm:$0xf0] }
  0x39   :  { %v1932_v46 = vor.u32 %v2143_v34, %v1931_v33  ;;  %v2478_v33 = vpack.c.bf16 %v110_v27, %v109_v26  ;;  %v2181_v34 = vld [vmem:[#allocation8 + $0xc4] sm:$0xf]  ;;  %v2047_v13 = vld [vmem:[#allocation8 + $0x68] sm:$0xf]  ;;  %v2172_v14 = vld [vmem:[#allocation8 + $0x74] sm:$0xf0] }
  0x3a   :  { %233 = vmatmul.bf16.vlgmr.msra.gmra.mxu0 %v2457_v44  ;;  %248 = vmatmul.bf16.vlgmr.msra.gmra.mxu1 %v2459_v45  ;;  %v2168_v26 = vld [vmem:[#allocation8 + $0x54] sm:$0xf0] }
  0x3b   :  { %743 = vmatpush.bf16.msrb.mxu0 %v1988_v40  ;;  %258 = vmatmul.bf16.vlgmr.msra.gmra.mxu2 %v2461_v48  ;;  %v1927_v40 = vld [vmem:[#allocation7 + $0x38] sm:$0xf] }
  0x3c   :  { %694 = vmatpush.bf16.msrb.mxu3 %v1984_v39  ;;  %274 = vmatpush.bf16.msrb.mxu1 %v1892_v49  ;;  %v1921_v39 = vld [vmem:[#allocation7 + $0x3c] sm:$0xf0]  ;;  %v1849_v49 = vld [vmem:[#allocation5 + $0x28] sm:$0xf0]  ;;  %v1928_v55 = vor.u32 %v2141_v41, %v1927_v40  ;;  %v2183_v40 = vld [vmem:[#allocation8 + $0xcc] sm:$0xf0] }
  0x3d   :  { %645 = vmatpush.bf16.msrb.mxu2 %v1980_v50  ;;  %268 = vmatmul.bf16.vlgmr.msra.gmra.mxu3 %v2463_v53  ;;  %v1924_v50 = vor.u32 %v2139_v35, %v1921_v39  ;;  %v1852_v59 = vor.u32 %v2121_v47, %v1849_v49  ;;  %v2089_v35 = vld [vmem:[#allocation8 + $0xd0] sm:$0xf0]  ;;  %v2087_v39 = vld [vmem:[#allocation8 + $0xc0] sm:$0xf]  ;;  %v2097_v47 = vld [vmem:[#allocation8 + $0xd8] sm:$0xf0] }
  0x3e   :  { %v2092_v41 = vor.u32 %v2181_v34, %v2089_v35  ;;  %v2177_v49 = vld [vmem:[#allocation8 + $0xa4] sm:$0xf]  ;;  %v2033_v34 = vld [vmem:[#allocation8 + $0x58] sm:$0xf0] }
  0x3f   :  { %744 = vmatpush.bf16.msrb.mxu0 %v1976_v58  ;;  %v2138_v58 = vld [vmem:[#allocation7 + $0x28] sm:$0xf0] }
  0x40   :  { %695 = vmatpush.bf16.msrb.mxu3 %v1972_v54  ;;  %275 = vmatpush.bf16.msrb.mxu1 %v1884_v62  ;;  %v2136_v54 = vld [vmem:[#allocation7 + $0x1c] sm:$0xf]  ;;  %v1916_v4 = vor.u32 %v2138_v58, %v1915_v57  ;;  %v2071_v57 = vld [vmem:[#allocation8 + $0xa0] sm:$0xf]  ;;  %v2179_v58 = vld [vmem:[#allocation8 + $0xac] sm:$0xf0] }
  0x41   :  { %646 = vmatpush.bf16.msrb.mxu2 %v1968_v63  ;;  %v1841_v62 = vld [vmem:[#allocation5 + $0x18] sm:$0xf0]  ;;  %v1907_v63 = vld [vmem:[#allocation7 + $0x18] sm:$0xf]  ;;  %v1912_v0 = vor.u32 %v2136_v54, %v1909_v56 }
  0x42   :  { %v1844_v8 = vor.u32 %v2119_v61, %v1841_v62  ;;  %v2180_v54 = vld [vmem:[#allocation8 + $0xb4] sm:$0xf0]  ;;  %v2081_v61 = vld [vmem:[#allocation8 + $0xb8] sm:$0xf0]  ;;  %v2173_v62 = vld [vmem:[#allocation8 + $0x84] sm:$0xf] }
  0x43   :  { %745 = vmatpush.bf16.msrb.mxu0 %v1964_v6  ;;  %v1903_v6 = vld [vmem:[#allocation7 + $0x8] sm:$0xf]  ;;  %v2080_v56 = vor.u32 %v2180_v54, %v2079_v52  ;;  %v2017_v52 = vld [vmem:[#allocation8 + $0x38] sm:$0xf0] }
  0x44   :  { %696 = vmatpush.bf16.msrb.mxu3 %v1960_v2  ;;  %276 = vmatpush.bf16.msrb.mxu1 %v1876_v10  ;;  %v2133_v2 = vld [vmem:[#allocation7 + $0x4] sm:$0xf]  ;;  %v2186_v10 = vld [vmem:[#allocation8 + $0xec] sm:$0xf]  ;;  %v1904_v19 = vor.u32 %v2135_v7, %v1903_v6  ;;  %v2175_v6 = vld [vmem:[#allocation8 + $0x8c] sm:$0xf0] }
  0x45   :  { %647 = vmatpush.bf16.msrb.mxu2 %v1956_v12  ;;  %v1908_v12 = vor.u32 %v2137_v1, %v1907_v63  ;;  %v1900_v15 = vor.u32 %v2133_v2, %v1897_v3  ;;  %v2063_v1 = vld [vmem:[#allocation8 + $0x88] sm:$0xf]  ;;  %v2176_v2 = vld [vmem:[#allocation8 + $0x94] sm:$0xf0]  ;;  %v2056_v7 = vor.u32 %v2175_v6, %v2055_v5 }
  0x47   :  { %746 = vmatpush.bf16.msrb.mxu0 %v1952_v20  ;;  %v2105_v20 = vld [vmem:[#allocation8 + $0xf0] sm:$0xf0] }
  0x48   :  { %697 = vmatpush.bf16.msrb.mxu3 %v1948_v16  ;;  %277 = vmatpush.bf16.msrb.mxu1 %v1868_v24  ;;  %v1895_v16 = vld [vmem:[#allocation7] sm:$0xf]  ;;  %v2116_v24 = vor.u32 %v2186_v10, %v2113_v11  ;;  %v2108_v31 = vor.u32 %v2185_v18, %v2105_v20  ;;  %v2169_v10 = vld [vmem:[#allocation8 + $0x64] sm:$0xf]  ;;  %v2171_v18 = vld [vmem:[#allocation8 + $0x6c] sm:$0xf0] }
  0x49   :  { %648 = vmatpush.bf16.msrb.mxu2 %v1944_v28  ;;  %v1896_v28 = vor.u32 %v2134_v17, %v1895_v16  ;;  %v2048_v16 = vor.u32 %v2172_v14, %v2047_v13  ;;  %v2039_v17 = vld [vmem:[#allocation8 + $0x60] sm:$0xf]  ;;  %v2170_v20 = vld [vmem:[#allocation8 + $0x6c] sm:$0xf] }
  0x4a   :  { %238 = vmatmul.bf16.gmra.mxu0 %v2469_v37  ;;  %253 = vmatmul.bf16.gmra.mxu1 %v2471_v38 }
  0x4b   :  { %747 = vmatpush.bf16.msrb.mxu0 %v1940_v36  ;;  %263 = vmatmul.bf16.gmra.mxu2 %v2473_v42  ;;  %v2096_v36 = vor.u32 %v2184_v30, %v2095_v29  ;;  %v2023_v29 = vld [vmem:[#allocation8 + $0x40] sm:$0xf]  ;;  %v2167_v30 = vld [vmem:[#allocation8 + $0x4c] sm:$0xf0] }
  0x4c   :  { %698 = vmatpush.bf16.msrb.mxu3 %v1936_v32  ;;  %278 = vmatpush.bf16.msrb.mxu1 %v1860_v43  ;;  %v2104_v32 = vor.u32 %v2187_v23, %v2103_v22  ;;  %v2088_v43 = vor.u32 %v2183_v40, %v2087_v39  ;;  %v2165_v22 = vld [vmem:[#allocation8 + $0x44] sm:$0xf]  ;;  %v2009_v39 = vld [vmem:[#allocation8 + $0x30] sm:$0xf0]  ;;  %v2015_v40 = vld [vmem:[#allocation8 + $0x28] sm:$0xf] }
  0x4d   :  { %649 = vmatpush.bf16.msrb.mxu2 %v1932_v46  ;;  %v2182_v46 = vld [vmem:[#allocation8 + $0xcc] sm:$0xf] }
  0x4f   :  { %748 = vmatpush.bf16.msrb.mxu0 %v1928_v55  ;;  %v2076_v55 = vor.u32 %v2177_v49, %v2073_v51  ;;  %v2163_v49 = vld [vmem:[#allocation8 + $0x2c] sm:$0xf0]  ;;  %v2162_v51 = vld [vmem:[#allocation8 + $0x2c] sm:$0xf] }
  0x50   :  { %699 = vmatpush.bf16.msrb.mxu3 %v1924_v50  ;;  %279 = vmatpush.bf16.msrb.mxu1 %v1852_v59  ;;  %v2100_v50 = vor.u32 %v2182_v46, %v2097_v47  ;;  %v2072_v59 = vor.u32 %v2179_v58, %v2071_v57  ;;  %v2007_v47 = vld [vmem:[#allocation8 + $0x20] sm:$0xf]  ;;  %v2020_v54 = vor.u32 %v2162_v51, %v2017_v52  ;;  %v1999_v57 = vld [vmem:[#allocation8 + $0x8] sm:$0xf] }
  0x51   :  { %650 = vmatpush.bf16.msrb.mxu2 %v1920_v60  ;;  %v2178_v60 = vld [vmem:[#allocation8 + $0xac] sm:$0xf] }
  0x52   :  { %v2084_v63 = vor.u32 %v2178_v60, %v2081_v61 }
  0x53   :  { %749 = vmatpush.bf16.msrb.mxu0 %v1916_v4  ;;  %v2064_v4 = vor.u32 %v2176_v2, %v2063_v1  ;;  %v2158_v2 = vld [vmem:[#allocation8 + $0xc] sm:$0xf] }
  0x54   :  { %700 = vmatpush.bf16.msrb.mxu3 %v1912_v0  ;;  %280 = vmatpush.bf16.msrb.mxu1 %v1844_v8  ;;  %v2057_v0 = vld [vmem:[#allocation8 + $0x90] sm:$0xf0]  ;;  %v2174_v8 = vld [vmem:[#allocation8 + $0x8c] sm:$0xf] }
  0x55   :  { %651 = vmatpush.bf16.msrb.mxu2 %v1908_v12  ;;  %v2060_v3 = vor.u32 %v2173_v62, %v2057_v0  ;;  %v2068_v11 = vor.u32 %v2174_v8, %v2065_v9  ;;  %v2041_v12 = vld [vmem:[#allocation8 + $0x70] sm:$0xf0]  ;;  %v2159_v0 = vld [vmem:[#allocation8 + $0xc] sm:$0xf0] }
  0x57   :  { %750 = vmatpush.bf16.msrb.mxu0 %v1904_v19  ;;  %v2040_v19 = vor.u32 %v2171_v18, %v2039_v17 }
  0x58   :  { %701 = vmatpush.bf16.msrb.mxu3 %v1900_v15  ;;  %281 = vmatpush.bf16.msrb.mxu1 %v1836_v25  ;;  %v2044_v15 = vor.u32 %v2169_v10, %v2041_v12  ;;  %v2031_v25 = vld [vmem:[#allocation8 + $0x48] sm:$0xf] }
  0x59   :  { %652 = vmatpush.bf16.msrb.mxu2 %v1896_v28  ;;  %v2032_v28 = vor.u32 %v2168_v26, %v2031_v25 }
  0x5a   :  { %243 = vmatmul.bf16.gmra.mxu0 %v2478_v33 }
  0x5b   :  { %1338 = vmatpush.bf16.msra.mxu0 %v2116_v24  ;;  %702 = vmatmul.bf16.vlgmr.msrb.gmra.mxu3 %v2457_v44  ;;  %v2025_v24 = vld [vmem:[#allocation8 + $0x50] sm:$0xf0] }
  0x5c   :  { %1289 = vmatpush.bf16.msra.mxu3 %v2112_v21  ;;  %1191 = vmatpush.bf16.msra.mxu1 %v2104_v32  ;;  %v2049_v21 = vld [vmem:[#allocation8 + $0x78] sm:$0xf0]  ;;  %v2028_v27 = vor.u32 %v2165_v22, %v2025_v24  ;;  %v2166_v32 = vld [vmem:[#allocation8 + $0x4c] sm:$0xf] }
  0x5d   :  { %1240 = vmatpush.bf16.msra.mxu2 %v2108_v31  ;;  %282 = vmatmul.bf16.vlgmr.msrb.gmra.mxu1 %v2457_v44  ;;  %v2052_v23 = vor.u32 %v2170_v20, %v2049_v21  ;;  %v2024_v31 = vor.u32 %v2167_v30, %v2023_v29  ;;  %v2036_v35 = vor.u32 %v2166_v32, %v2033_v34 }
  0x5e   :  { %653 = vmatmul.bf16.vlgmr.msrb.gmra.mxu2 %v2457_v44 }
  0x5f   :  { %1339 = vmatpush.bf16.msra.mxu0 %v2100_v50  ;;  %v2008_v50 = vor.u32 %v2163_v49, %v2007_v47 }
  0x60   :  { %1290 = vmatpush.bf16.msra.mxu3 %v2096_v36  ;;  %1192 = vmatpush.bf16.msra.mxu1 %v2088_v43  ;;  %v2161_v36 = vld [vmem:[#allocation8 + $0x24] sm:$0xf]  ;;  %v2164_v43 = vld [vmem:[#allocation8 + $0x34] sm:$0xf0] }
  0x61   :  { %1241 = vmatpush.bf16.msra.mxu2 %v2092_v41  ;;  %v2012_v41 = vor.u32 %v2161_v36, %v2009_v39  ;;  %v2016_v46 = vor.u32 %v2164_v43, %v2015_v40  ;;  %v2566_v40 = vld [vmem:[%s3105_s4] ss:$0 sm:$0xff] }
  0x63   :  { %1340 = vmatpush.bf16.msra.mxu0 %v2084_v63  ;;  %v1991_v63 = vld [vmem:[#allocation8] sm:$0xf] }
  0x64   :  { %1291 = vmatpush.bf16.msra.mxu3 %v2080_v56  ;;  %1193 = vmatpush.bf16.msra.mxu1 %v2072_v59  ;;  %v1993_v56 = vld [vmem:[#allocation8 + $0x10] sm:$0xf0]  ;;  %v2160_v59 = vld [vmem:[#allocation8 + $0x14] sm:$0xf0]  ;;  %v1992_v1 = vor.u32 %v2159_v0, %v1991_v63 }
  0x65   :  { %1242 = vmatpush.bf16.msra.mxu2 %v2076_v55  ;;  %v2157_v55 = vld [vmem:[#allocation8 + $0x4] sm:$0xf]  ;;  %v2000_v60 = vor.u32 %v2160_v59, %v1999_v57 }
  0x66   :  { %v1996_v58 = vor.u32 %v2157_v55, %v1993_v56 }
  0x67   :  { %1341 = vmatpush.bf16.msra.mxu0 %v2068_v11 }
  0x68   :  { %1292 = vmatpush.bf16.msra.mxu3 %v2064_v4  ;;  %1194 = vmatpush.bf16.msra.mxu1 %v2056_v7 }
  0x69   :  { %1243 = vmatpush.bf16.msra.mxu2 %v2060_v3  ;;  %v2001_v3 = vld [vmem:[#allocation8 + $0x18] sm:$0xf0] }
  0x6a   :  { %751 = vmatmul.bf16.vlgmr.msrb.gmra.mxu0 %v2457_v44  ;;  %v2004_v4 = vor.u32 %v2158_v2, %v2001_v3 }
  0x6b   :  { %707 = vmatmul.bf16.gmra.mxu3 %v2469_v37  ;;  %1342 = vmatpush.bf16.msra.mxu0 %v2052_v23 }
  0x6c   :  { %1293 = vmatpush.bf16.msra.mxu3 %v2048_v16  ;;  %1195 = vmatpush.bf16.msra.mxu1 %v2040_v19  ;;  %v339_v19 = vlaneseq }
  0x6d   :  { %287 = vmatmul.bf16.gmra.mxu1 %v2469_v37  ;;  %1244 = vmatpush.bf16.msra.mxu2 %v2044_v15 }
  0x6e   :  { %658 = vmatmul.bf16.gmra.mxu2 %v2469_v37  ;;  %v2546_v21 = vshrl.u32 %v339_v19, 7 }
  0x6f   :  { %1343 = vmatpush.bf16.msra.mxu0 %v2036_v35 }
  0x70   :  { %1294 = vmatpush.bf16.msra.mxu3 %v2032_v28  ;;  %1196 = vmatpush.bf16.msra.mxu1 %v2024_v31  ;;  %vm341_vm0 = vcmp.lt.s32.totalorder %v2546_v21, 7  ;;  %vm856_vm2 = vcmp.lt.s32.totalorder %v2546_v21, 6  ;;  %vm1499_vm11 = vcmp.lt.s32.totalorder %v2546_v21, 5 }
  0x71   :  { %1245 = vmatpush.bf16.msra.mxu2 %v2028_v27 }
  0x73   :  { %1344 = vmatpush.bf16.msra.mxu0 %v2020_v54 }
  0x74   :  { %1295 = vmatpush.bf16.msra.mxu3 %v2016_v46  ;;  %1197 = vmatpush.bf16.msra.mxu1 %v2008_v50  ;;  %v2572_v46 = vadd.s32 8, %v2546_v21 }
  0x75   :  { %1246 = vmatpush.bf16.msra.mxu2 %v2012_v41 }
  0x76   :  { %vm412_vm1 = vcmp.lt.s32.totalorder %v2572_v46, 15  ;;  %vm926_vm3 = vcmp.lt.s32.totalorder %v2572_v46, 14  ;;  %vm1569_vm12 = vcmp.lt.s32.totalorder %v2572_v46, 13  ;;  %v2228_v46 = vld [vmem:[%s3107_s6] ss:$0 sm:$0xff] }
  0x77   :  { %1345 = vmatpush.bf16.msra.mxu0 %v2004_v4 }
  0x78   :  { %1296 = vmatpush.bf16.msra.mxu3 %v2000_v60  ;;  %1198 = vmatpush.bf16.msra.mxu1 %v1992_v1 }
  0x79   :  { %1247 = vmatpush.bf16.msra.mxu2 %v1996_v58 }
  0x7a   :  { %756 = vmatmul.bf16.gmra.mxu0 %v2469_v37 }
  0x7b   :  { %712 = vmatmul.bf16.gmra.mxu3 %v2478_v33 }
  0x7d   :  { %292 = vmatmul.bf16.gmra.mxu1 %v2478_v33 }
  0x7e   :  { %663 = vmatmul.bf16.gmra.mxu2 %v2478_v33 }
  0x8a   :  { %761 = vmatmul.bf16.gmra.mxu0 %v2478_v33 }
  0x8b   :  { %717 = vmatmul.bf16.gmra.mxu3 %v2459_v45 }
  0x8d   :  { %297 = vmatmul.bf16.gmra.mxu1 %v2459_v45 }
  0x8e   :  { %668 = vmatmul.bf16.gmra.mxu2 %v2459_v45 }
  0x9a   :  { %766 = vmatmul.bf16.gmra.mxu0 %v2459_v45 }
  0x9b   :  { %722 = vmatmul.bf16.gmra.mxu3 %v2471_v38 }
  0x9d   :  { %302 = vmatmul.bf16.gmra.mxu1 %v2471_v38 }
  0x9e   :  { %673 = vmatmul.bf16.gmra.mxu2 %v2471_v38 }
  0xaa   :  { %771 = vmatmul.bf16.gmra.mxu0 %v2471_v38 }
  0xab   :  { %727 = vmatmul.bf16.gmra.mxu3 %v2461_v48 }
  0xad   :  { %307 = vmatmul.bf16.gmra.mxu1 %v2461_v48 }
  0xae   :  { %678 = vmatmul.bf16.gmra.mxu2 %v2461_v48 }
  0xb7   :  { %v234_v61 = vpop.f32.mrf.mxu0  ;;  %v2504_v62 = vpop.f32.mrf.mxu1 }
  0xba   :  { %776 = vmatmul.bf16.gmra.mxu0 %v2461_v48 }
  0xbb   :  { %732 = vmatmul.bf16.gmra.mxu3 %v2473_v42 }
  0xbd   :  { %312 = vmatmul.bf16.gmra.mxu1 %v2473_v42 }
  0xbe   :  { %683 = vmatmul.bf16.gmra.mxu2 %v2473_v42  ;;  %v2510_v5 = vpop.f32.mrf.mxu2 }
  0xbf   :  { %v236_v6 = vpop.f32.mrf.mxu0  ;;  %v2512_v7 = vpop.f32.mrf.mxu1 }
  0xc0   :  { %v2516_v9 = vpop.f32.mrf.mxu3 }
  0xc6   :  { %v2514_v8 = vpop.f32.mrf.mxu2 }
  0xc7   :  { %v2518_v10 = vpop.f32.mrf.mxu0  ;;  %v2520_v11 = vpop.f32.mrf.mxu1 }
  0xc8   :  { %v2532_v15 = vpop.f32.mrf.mxu3 }
  0xca   :  { %781 = vmatmul.bf16.gmra.mxu0 %v2473_v42 }
  0xcb   :  { %737 = vmatmul.bf16.gmra.mxu3 %v2463_v53 }
  0xcd   :  { %317 = vmatmul.bf16.gmra.mxu1 %v2463_v53 }
  0xce   :  { %688 = vmatmul.bf16.gmra.mxu2 %v2463_v53  ;;  %v2526_v12 = vpop.f32.mrf.mxu2 }
  0xcf   :  { %v2528_v13 = vpop.f32.mrf.mxu0  ;;  %v2530_v14 = vpop.f32.mrf.mxu1 }
  0xd6   :  { %v2534_v16 = vpop.f32.mrf.mxu2 }
  0xd7   :  { %v2536_v17 = vpop.f32.mrf.mxu0 }
  0xda   :  { %v2538_v18 = vpop.f32.mrf.mxu1  ;;  %786 = vmatmul.bf16.gmra.mxu0 %v2463_v53 }
  0xdb   :  { %1297 = vmatmul.bf16.vlgmr.msra.gmra.mxu3 %v2457_v44  ;;  %v323_v22 = vrot.slane %v2538_v18, 1 }
  0xdd   :  { %1199 = vmatmul.bf16.vlgmr.msra.gmra.mxu1 %v2457_v44 }
  0xde   :  { %v2543_v20 = vpop.f32.mrf.mxu3  ;;  %1248 = vmatmul.bf16.vlgmr.msra.gmra.mxu2 %v2457_v44 }
  0xdf   :  { %v2549_v24 = vpop.f32.mrf.mxu0  ;;  %v792_v27 = vrot.slane %v2543_v20, 1 }
  0xe1   :  { %v654_v23 = vpop.f32.mrf.mxu2 }
  0xe2   :  { %v285_v25 = vpop.f32.mrf.mxu1 }
  0xe3   :  { %v324_v26 = vrot.slane %v285_v25, 1 }
  0xe5   :  { %v356_v28 = vsel %vm341_vm0, %v323_v22, %v324_v26 }
  0xe6   :  { %v358_v29 = vadd.f32 %v356_v28, %v234_v61  ;;  %v705_v30 = vpop.f32.mrf.mxu3 }
  0xe7   :  { %v793_v31 = vrot.slane %v705_v30, 1  ;;  %v2561_v39 = vpop.f32.mrf.mxu0 }
  0xe8   :  { %v378_v50 = vadd.f32 %v2566_v40, %v358_v29  ;;  %v840_v60 = vrot.slane %v2561_v39, 2 }
  0xe9   :  { %v822_v32 = vsel %vm341_vm0, %v792_v27, %v793_v31  ;;  %v656_v34 = vpop.f32.mrf.mxu2 }
  0xea   :  { %v824_v35 = vadd.f32 %v822_v32, %v654_v23  ;;  %v288_v36 = vpop.f32.mrf.mxu1  ;;  %1346 = vmatmul.bf16.vlgmr.msra.gmra.mxu0 %v2457_v44  ;;  %v394_v59 = vmax.f32 %v378_v50, 0.0 }
  0xeb   :  { %v325_v41 = vrot.slane %v288_v36, 1  ;;  %1302 = vmatmul.bf16.gmra.mxu3 %v2469_v37 }
  0xed   :  { %v355_v43 = vsel %vm341_vm0, %v324_v26, %v325_v41  ;;  %1204 = vmatmul.bf16.gmra.mxu1 %v2469_v37 }
  0xee   :  { %v359_v47 = vadd.f32 %v355_v43, %v236_v6  ;;  %v708_v49 = vpop.f32.mrf.mxu3  ;;  %1253 = vmatmul.bf16.gmra.mxu2 %v2469_v37 }
  0xef   :  { %v794_v51 = vrot.slane %v708_v49, 1  ;;  %v754_v58 = vpop.f32.mrf.mxu0 }
  0xf0   :  { %v379_v52 = vadd.f32 %v2566_v40, %v359_v47  ;;  %v841_v63 = vrot.slane %v754_v58, 2 }
  0xf1   :  { %v821_v54 = vsel %vm341_vm0, %v793_v31, %v794_v51  ;;  %v659_v55 = vpop.f32.mrf.mxu2  ;;  %v2598_v31 = vld [vmem:[%s3105_s4 + $0x1] ss:$0 sm:$0xff] }
  0xf2   :  { %v395_v56 = vmax.f32 %v379_v52, 0.0  ;;  %v825_v44 = vadd.f32 %v821_v54, %v656_v34  ;;  %v290_v57 = vpop.f32.mrf.mxu1  ;;  %v871_v3 = vsel %vm856_vm2, %v840_v60, %v841_v63 }
  0xf3   :  { %v326_v61 = vrot.slane %v290_v57, 1  ;;  %v873_v6 = vadd.f32 %v871_v3, %v824_v35 }
  0xf4   :  { %v414_v0 = vsel %vm412_vm1, %v395_v56, -inf }
  0xf5   :  { %v429_v1 = vmax.f32 %v394_v59, %v414_v0  ;;  %v354_v2 = vsel %vm341_vm0, %v325_v41, %v326_v61  ;;  %v893_v50 = vadd.f32 %v2598_v31, %v873_v6 }
  0xf6   :  { %v360_v4 = vadd.f32 %v354_v2, %v2518_v10  ;;  %v710_v19 = vpop.f32.mrf.mxu3 }
  0xf7   :  { %v795_v23 = vrot.slane %v710_v19, 1  ;;  %v757_v30 = vpop.f32.mrf.mxu0  ;;  %v430_v10 = vrot.slane %v429_v1, 4 }
  0xf8   :  { %v842_v34 = vrot.slane %v757_v30, 2  ;;  %v380_v49 = vadd.f32 %v2566_v40, %v360_v4 }
  0xf9   :  { %v820_v25 = vsel %vm341_vm0, %v794_v51, %v795_v23  ;;  %v661_v26 = vpop.f32.mrf.mxu2  ;;  %v431_v52 = vmax.f32 %v429_v1, %v430_v10 }
  0xfa   :  { %v826_v28 = vadd.f32 %v820_v25, %v659_v55  ;;  %v293_v29 = vpop.f32.mrf.mxu1  ;;  %v870_v36 = vsel %vm856_vm2, %v841_v63, %v842_v34  ;;  %1351 = vmatmul.bf16.gmra.mxu0 %v2469_v37  ;;  %v909_v63 = vmax.f32 %v893_v50, 0.0 }
  0xfb   :  { %v327_v32 = vrot.slane %v293_v29, 1  ;;  %1307 = vmatmul.bf16.gmra.mxu3 %v2478_v33  ;;  %v874_v43 = vadd.f32 %v870_v36, %v825_v44  ;;  %v432_v1 = vrot.slane %v431_v52, 2 }
  0xfd   :  { %v353_v35 = vsel %vm341_vm0, %v326_v61, %v327_v32  ;;  %1209 = vmatmul.bf16.gmra.mxu1 %v2478_v33  ;;  %v894_v55 = vadd.f32 %v2598_v31, %v874_v43  ;;  %v396_v61 = vmax.f32 %v380_v49, 0.0  ;;  %v433_v36 = vmax.f32 %v431_v52, %v432_v1 }
  0xfe   :  { %v361_v41 = vadd.f32 %v353_v35, %v2528_v13  ;;  %v713_v47 = vpop.f32.mrf.mxu3  ;;  %1258 = vmatmul.bf16.gmra.mxu2 %v2478_v33 }
  0xff   :  { %v796_v51 = vrot.slane %v713_v47, 1  ;;  %v910_v44 = vmax.f32 %v894_v55, 0.0  ;;  %v759_v59 = vpop.f32.mrf.mxu0 }
 0x100   :  { %v381_v54 = vadd.f32 %v2566_v40, %v361_v41  ;;  %v843_v2 = vrot.slane %v759_v59, 2 }
 0x101   :  { %v819_v37 = vsel %vm341_vm0, %v795_v23, %v796_v51  ;;  %v664_v13 = vpop.f32.mrf.mxu2  ;;  %v928_v4 = vsel %vm926_vm3, %v910_v44, -inf }
 0x102   :  { %v397_v56 = vmax.f32 %v381_v54, 0.0  ;;  %v827_v57 = vadd.f32 %v819_v37, %v661_v26  ;;  %v295_v58 = vpop.f32.mrf.mxu1  ;;  %v943_v19 = vmax.f32 %v909_v63, %v928_v4  ;;  %v869_v25 = vsel %vm856_vm2, %v842_v34, %v843_v2 }
 0x103   :  { %v328_v0 = vrot.slane %v295_v58, 1  ;;  %v875_v29 = vadd.f32 %v869_v25, %v826_v28 }
 0x104   :  { %v416_v3 = vsel %vm412_vm1, %v397_v56, -inf  ;;  %v944_v34 = vrot.slane %v943_v19, 4 }
 0x105   :  { %v436_v6 = vmax.f32 %v396_v61, %v416_v3  ;;  %v352_v23 = vsel %vm341_vm0, %v327_v32, %v328_v0  ;;  %v895_v61 = vadd.f32 %v2598_v31, %v875_v29 }
 0x106   :  { %v362_v26 = vadd.f32 %v352_v23, %v2536_v17  ;;  %v715_v30 = vpop.f32.mrf.mxu3  ;;  %v434_v17 = vrot.slane %v433_v36, 1 }
 0x107   :  { %v437_v10 = vrot.slane %v436_v6, 4  ;;  %v797_v35 = vrot.slane %v715_v30, 1  ;;  %v762_v54 = vpop.f32.mrf.mxu0  ;;  %v911_v29 = vmax.f32 %v895_v61, 0.0 }
 0x108   :  { %v844_v37 = vrot.slane %v762_v54, 2 }
 0x109   :  { %v438_v41 = vmax.f32 %v436_v6, %v437_v10  ;;  %v818_v43 = vsel %vm341_vm0, %v796_v51, %v797_v35  ;;  %v666_v47 = vpop.f32.mrf.mxu2  ;;  %v382_v51 = vadd.f32 %v2566_v40, %v362_v26 }
 0x10a   :  { %v828_v49 = vadd.f32 %v818_v43, %v664_v13  ;;  %v298_v50 = vpop.f32.mrf.mxu1  ;;  %v868_v52 = vsel %vm856_vm2, %v843_v2, %v844_v37  ;;  %1356 = vmatmul.bf16.gmra.mxu0 %v2478_v33  ;;  %v435_v33 = vmax.f32 %v433_v36, %v434_v17 }
 0x10b   :  { %v439_v55 = vrot.slane %v438_v41, 2  ;;  %v329_v32 = vrot.slane %v298_v50, 1  ;;  %1312 = vmatmul.bf16.gmra.mxu3 %v2459_v45  ;;  %v876_v44 = vadd.f32 %v868_v52, %v827_v57  ;;  %v398_v4 = vmax.f32 %v382_v51, 0.0 }
 0x10d   :  { %v440_v28 = vmax.f32 %v438_v41, %v439_v55  ;;  %v351_v56 = vsel %vm341_vm0, %v328_v0, %v329_v32  ;;  %1214 = vmatmul.bf16.gmra.mxu1 %v2459_v45  ;;  %v945_v0 = vmax.f32 %v943_v19, %v944_v34  ;;  %v896_v2 = vadd.f32 %v2598_v31, %v876_v44 }
 0x10e   :  { %v363_v13 = vadd.f32 %v351_v56, %v2549_v24  ;;  %v718_v58 = vpop.f32.mrf.mxu3  ;;  %1263 = vmatmul.bf16.gmra.mxu2 %v2459_v45 }
 0x10f   :  { %v441_v59 = vrot.slane %v440_v28, 1  ;;  %v798_v63 = vrot.slane %v718_v58, 1  ;;  %v912_v23 = vmax.f32 %v896_v2, 0.0  ;;  %v764_v30 = vpop.f32.mrf.mxu0  ;;  %v946_v43 = vrot.slane %v945_v0, 2 }
 0x110   :  { %v383_v1 = vadd.f32 %v2566_v40, %v363_v13  ;;  %v845_v19 = vrot.slane %v764_v30, 2 }
 0x111   :  { %v442_v3 = vmax.f32 %v440_v28, %v441_v59  ;;  %v817_v24 = vsel %vm341_vm0, %v797_v35, %v798_v63  ;;  %v669_v57 = vpop.f32.mrf.mxu2  ;;  %v930_v50 = vsel %vm926_vm3, %v912_v23, -inf  ;;  %v947_v51 = vmax.f32 %v945_v0, %v946_v43 }
 0x112   :  { %v399_v6 = vmax.f32 %v383_v1, 0.0  ;;  %v829_v25 = vadd.f32 %v817_v24, %v666_v47  ;;  %v300_v26 = vpop.f32.mrf.mxu1  ;;  %v950_v54 = vmax.f32 %v911_v29, %v930_v50  ;;  %v867_v55 = vsel %vm856_vm2, %v844_v37, %v845_v19 }
 0x113   :  { %v330_v10 = vrot.slane %v300_v26, 1  ;;  %v1651_v41 = vsel %vm1650_vm4, %v442_v3, %v435_v33  ;;  %v877_v47 = vadd.f32 %v867_v55, %v828_v49  ;;  %v948_v0 = vrot.slane %v947_v51, 1 }
 0x114   :  { %v418_v36 = vsel %vm412_vm1, %v399_v6, -inf  ;;  %v951_v28 = vrot.slane %v950_v54, 4 }
 0x115   :  { %v443_v35 = vmax.f32 %v398_v4, %v418_v36  ;;  %v350_v56 = vsel %vm341_vm0, %v329_v32, %v330_v10 }
 0x116   :  { %v2649_v34 = vpop.f32.mrf.mxu3  ;;  %v952_v44 = vmax.f32 %v950_v54, %v951_v28  ;;  %v364_v61 = vadd.f32 %v350_v56, %v2504_v62 }
 0x117   :  { %v444_v17 = vrot.slane %v443_v35, 4  ;;  %v799_v52 = vrot.slane %v2649_v34, 1  ;;  %v767_v1 = vpop.f32.mrf.mxu0 }
 0x118   :  { %v953_v33 = vrot.slane %v952_v44, 2  ;;  %v846_v32 = vrot.slane %v767_v1, 2 }
 0x119   :  { %v445_v13 = vmax.f32 %v443_v35, %v444_v17  ;;  %v816_v58 = vsel %vm341_vm0, %v798_v63, %v799_v52  ;;  %v671_v59 = vpop.f32.mrf.mxu2 }
 0x11a   :  { %v830_v37 = vadd.f32 %v816_v58, %v669_v57  ;;  %v2657_v49 = vpop.f32.mrf.mxu1  ;;  %v954_v4 = vmax.f32 %v952_v44, %v953_v33  ;;  %v866_v62 = vsel %vm856_vm2, %v845_v19, %v846_v32  ;;  %1361 = vmatmul.bf16.gmra.mxu0 %v2459_v45  ;;  %v384_v57 = vadd.f32 %v2566_v40, %v364_v61 }
 0x11b   :  { %v446_v2 = vrot.slane %v445_v13, 2  ;;  %v331_v3 = vrot.slane %v2657_v49, 1  ;;  %1317 = vmatmul.bf16.gmra.mxu3 %v2471_v38  ;;  %v878_v23 = vadd.f32 %v866_v62, %v829_v25  ;;  %v949_v45 = vmax.f32 %v947_v51, %v948_v0 }
 0x11c   :  { %v955_v29 = vrot.slane %v954_v4, 1  ;;  %v400_v25 = vmax.f32 %v384_v57, 0.0 }
 0x11d   :  { %v447_v24 = vmax.f32 %v445_v13, %v446_v2  ;;  %v349_v63 = vsel %vm341_vm0, %v330_v10, %v331_v3  ;;  %1219 = vmatmul.bf16.gmra.mxu1 %v2471_v38  ;;  %v897_v10 = vadd.f32 %v2598_v31, %v877_v47  ;;  %v898_v19 = vadd.f32 %v2598_v31, %v878_v23 }
 0x11e   :  { %v365_v6 = vadd.f32 %v349_v63, %v2512_v7  ;;  %v2670_v26 = vpop.f32.mrf.mxu3  ;;  %1268 = vmatmul.bf16.gmra.mxu2 %v2471_v38  ;;  %v956_v50 = vmax.f32 %v954_v4, %v955_v29 }
 0x11f   :  { %v448_v30 = vrot.slane %v447_v24, 1  ;;  %v914_v54 = vmax.f32 %v898_v19, 0.0  ;;  %v769_v34 = vpop.f32.mrf.mxu0  ;;  %v913_v17 = vmax.f32 %v897_v10, 0.0  ;;  %v800_v61 = vrot.slane %v2670_v26, 1  ;;  %v1712_v19 = vld [vmem:[#allocation10 + $0x78] sm:$0xff] }
 0x120   :  { %v385_v43 = vadd.f32 %v2566_v40, %v365_v6  ;;  %v847_v28 = vrot.slane %v769_v34, 2  ;;  %v1673_v56 = vsel %vm1650_vm4, %v956_v50, %v949_v45  ;;  %1749 = vmatpush.msrb.mxu1 %v1712_v19  ;;  %v1706_v19 = vld [vmem:[#allocation10 + $0x48] sm:$0xff] }
 0x121   :  { %v449_v36 = vmax.f32 %v447_v24, %v448_v30  ;;  %v2677_v7 = vpop.f32.mrf.mxu2  ;;  %v932_v51 = vsel %vm926_vm3, %v914_v54, -inf  ;;  %v815_v63 = vsel %vm341_vm0, %v799_v52, %v800_v61  ;;  %v1711_v54 = vld [vmem:[#allocation10 + $0x70] sm:$0xff] }
 0x122   :  { %v401_v35 = vmax.f32 %v385_v43, 0.0  ;;  %v2679_v55 = vpop.f32.mrf.mxu1  ;;  %v957_v58 = vmax.f32 %v913_v17, %v932_v51  ;;  %v865_v1 = vsel %vm856_vm2, %v846_v32, %v847_v28  ;;  %v831_v32 = vadd.f32 %v815_v63, %v671_v59  ;;  %1750 = vmatpush.msrb.mxu1 %v1711_v54 }
 0x123   :  { %v1653_v47 = vsel %vm1652_vm5, %v449_v36, %v1651_v41  ;;  %v879_v2 = vadd.f32 %v865_v1, %v830_v37  ;;  %v332_v45 = vrot.slane %v2679_v55, 1 }
 0x124   :  { %v420_v13 = vsel %vm412_vm1, %v401_v35, -inf  ;;  %v958_v41 = vrot.slane %v957_v58, 4 }
 0x125   :  { %v450_v44 = vmax.f32 %v400_v25, %v420_v13  ;;  %v899_v35 = vadd.f32 %v2598_v31, %v879_v2  ;;  %v1710_v13 = vld [vmem:[#allocation10 + $0x68] sm:$0xff]  ;;  %v348_v63 = vsel %vm341_vm0, %v331_v3, %v332_v45 }
 0x126   :  { %v2690_v33 = vpop.f32.mrf.mxu3  ;;  %v959_v4 = vmax.f32 %v957_v58, %v958_v41  ;;  %1751 = vmatpush.msrb.mxu1 %v1710_v13  ;;  %v1704_v13 = vld [vmem:[#allocation10 + $0x38] sm:$0xff] }
 0x127   :  { %v451_v0 = vrot.slane %v450_v44, 4  ;;  %v2698_v6 = vpop.f32.mrf.mxu0  ;;  %v915_v1 = vmax.f32 %v899_v35, 0.0  ;;  %v1705_v35 = vld [vmem:[#allocation10 + $0x40] sm:$0xff] }
 0x128   :  { %v960_v30 = vrot.slane %v959_v4, 2  ;;  %v848_v37 = vrot.slane %v2698_v6, 2 }
 0x129   :  { %v452_v24 = vmax.f32 %v450_v44, %v451_v0  ;;  %v2696_v62 = vpop.f32.mrf.mxu2  ;;  %v1709_v0 = vld [vmem:[#allocation10 + $0x60] sm:$0xff] }
 0x12a   :  { %v308_v57 = vpop.f32.mrf.mxu1  ;;  %v961_v43 = vmax.f32 %v959_v4, %v960_v30  ;;  %v864_v52 = vsel %vm856_vm2, %v847_v28, %v848_v37  ;;  %1366 = vmatmul.bf16.gmra.mxu0 %v2471_v38  ;;  %1752 = vmatpush.msrb.mxu1 %v1709_v0  ;;  %v1703_v0 = vld [vmem:[#allocation10 + $0x30] sm:$0xff] }
 0x12b   :  { %v453_v23 = vrot.slane %v452_v24, 2  ;;  %1322 = vmatmul.bf16.gmra.mxu3 %v2461_v48  ;;  %v333_v29 = vrot.slane %v308_v57, 1  ;;  %v880_v36 = vadd.f32 %v864_v52, %v831_v32 }
 0x12c   :  { %v962_v25 = vrot.slane %v961_v43, 1 }
 0x12d   :  { %v454_v10 = vmax.f32 %v452_v24, %v453_v23  ;;  %1224 = vmatmul.bf16.gmra.mxu1 %v2461_v48  ;;  %v347_v34 = vsel %vm341_vm0, %v332_v45, %v333_v29  ;;  %v900_v38 = vadd.f32 %v2598_v31, %v880_v36  ;;  %v1708_v23 = vld [vmem:[#allocation10 + $0x58] sm:$0xff] }
 0x12e   :  { %v2708_v50 = vpop.f32.mrf.mxu3  ;;  %1273 = vmatmul.bf16.gmra.mxu2 %v2461_v48  ;;  %v963_v17 = vmax.f32 %v961_v43, %v962_v25  ;;  %v367_v2 = vadd.f32 %v347_v34, %v2530_v14  ;;  %1753 = vmatpush.msrb.mxu1 %v1708_v23 }
 0x12f   :  { %v455_v59 = vrot.slane %v454_v10, 1  ;;  %v916_v51 = vmax.f32 %v900_v38, 0.0  ;;  %v2718_v58 = vpop.f32.mrf.mxu0  ;;  %v802_v34 = vrot.slane %v2708_v50, 1 }
 0x130   :  { %v2725_v24 = vsel %vm1652_vm5, %v963_v17, %v1673_v56  ;;  %v387_v30 = vadd.f32 %v2566_v40, %v367_v2  ;;  %v1707_v56 = vld [vmem:[#allocation10 + $0x50] sm:$0xff] }
 0x131   :  { %v456_v55 = vmax.f32 %v454_v10, %v455_v59  ;;  %v2716_v28 = vpop.f32.mrf.mxu2  ;;  %v934_v4 = vsel %vm926_vm3, %v916_v51, -inf  ;;  %v366_v10 = vadd.f32 %v348_v63, %v2520_v11  ;;  %1754 = vmatpush.msrb.mxu1 %v1707_v56  ;;  %v1728_v51 = vld [vmem:[#allocation10 + $0xf8] sm:$0xff] }
 0x132   :  { %v310_v44 = vpop.f32.mrf.mxu1  ;;  %v964_v57 = vmax.f32 %v915_v1, %v934_v4  ;;  %v403_v45 = vmax.f32 %v387_v30, 0.0  ;;  %1769 = vmatpush.msrb.mxu2 %v1728_v51  ;;  %v1727_v4 = vld [vmem:[#allocation10 + $0xf0] sm:$0xff]  ;;  %v1700_v51 = vld [vmem:[#allocation10 + $0x18] sm:$0xff] }
 0x133   :  { %v2722_v41 = vsel %vm1654_vm6, %v456_v55, %v1653_v47  ;;  %v334_v32 = vrot.slane %v310_v44, 1  ;;  %1755 = vmatpush.msrb.mxu1 %v1706_v19  ;;  %v386_v11 = vadd.f32 %v2566_v40, %v366_v10  ;;  %v801_v44 = vrot.slane %v2690_v33, 1  ;;  %v1726_v19 = vld [vmem:[#allocation10 + $0xe8] sm:$0xff] }
 0x134   :  { %v965_v47 = vrot.slane %v964_v57, 4  ;;  %v422_v1 = vsel %vm412_vm1, %v403_v45, -inf  ;;  %1770 = vmatpush.msrb.mxu2 %v1727_v4 }
 0x135   :  { %v346_v59 = vsel %vm341_vm0, %v333_v29, %v334_v32  ;;  %1756 = vmatpush.msrb.mxu1 %v1705_v35  ;;  %v1725_v35 = vld [vmem:[#allocation10 + $0xe0] sm:$0xff] }
 0x136   :  { %v2733_v14 = vpop.f32.mrf.mxu3  ;;  %v966_v43 = vmax.f32 %v964_v57, %v965_v47  ;;  %v368_v29 = vadd.f32 %v346_v59, %v2510_v5  ;;  %v813_v57 = vsel %vm341_vm0, %v801_v44, %v802_v34  ;;  %v849_v47 = vrot.slane %v2718_v58, 2  ;;  %1771 = vmatpush.msrb.mxu2 %v1726_v19 }
 0x137   :  { %v2741_v3 = vpop.f32.mrf.mxu0  ;;  %1757 = vmatpush.msrb.mxu1 %v1704_v13 }
 0x138   :  { %v967_v36 = vrot.slane %v966_v43, 2  ;;  %v388_v30 = vadd.f32 %v2566_v40, %v368_v29  ;;  %1772 = vmatpush.msrb.mxu2 %v1725_v35 }
 0x139   :  { %v2737_v52 = vpop.f32.mrf.mxu2  ;;  %1758 = vmatpush.msrb.mxu1 %v1703_v0 }
 0x13a   :  { %v2739_v49 = vpop.f32.mrf.mxu1  ;;  %v968_v54 = vmax.f32 %v966_v43, %v967_v36  ;;  %1371 = vmatmul.bf16.gmra.mxu0 %v2461_v48  ;;  %v402_v48 = vmax.f32 %v386_v11, 0.0  ;;  %v1702_v43 = vld [vmem:[#allocation10 + $0x28] sm:$0xff]  ;;  %v814_v36 = vsel %vm341_vm0, %v800_v61, %v801_v44  ;;  %v1701_v11 = vld [vmem:[#allocation10 + $0x20] sm:$0xff]  ;;  %v404_v29 = vmax.f32 %v388_v30, 0.0 }
 0x13b   :  { %v335_v25 = vrot.slane %v2739_v49, 1  ;;  %1327 = vmatmul.bf16.gmra.mxu3 %v2473_v42  ;;  %1759 = vmatpush.msrb.mxu1 %v1702_v43  ;;  %v863_v61 = vsel %vm856_vm2, %v848_v37, %v849_v47  ;;  %v832_v44 = vadd.f32 %v814_v36, %v2677_v7  ;;  %v1723_v37 = vld [vmem:[#allocation10 + $0xd0] sm:$0xff] }
 0x13c   :  { %v969_v2 = vrot.slane %v968_v54, 1  ;;  %v457_v23 = vmax.f32 %v402_v48, %v422_v1  ;;  %v1699_v48 = vld [vmem:[#allocation10 + $0x10] sm:$0xff] }
 0x13d   :  { %v345_v38 = vsel %vm341_vm0, %v334_v32, %v335_v25  ;;  %1229 = vmatmul.bf16.gmra.mxu1 %v2473_v42 }
 0x13e   :  { %v369_v55 = vadd.f32 %v345_v38, %v2514_v8  ;;  %v2756_v17 = vpop.f32.mrf.mxu3  ;;  %1278 = vmatmul.bf16.gmra.mxu2 %v2473_v42  ;;  %v850_v8 = vrot.slane %v2741_v3, 2  ;;  %v970_v63 = vmax.f32 %v968_v54, %v969_v2  ;;  %v833_v54 = vadd.f32 %v813_v57, %v2696_v62  ;;  %v1724_v62 = vld [vmem:[#allocation10 + $0xd8] sm:$0xff]  ;;  %1760 = vmatpush.msrb.mxu1 %v1701_v11  ;;  %v1722_v57 = vld [vmem:[#allocation10 + $0xc8] sm:$0xff]  ;;  %v1697_v3 = vld [vmem:[#allocation10] sm:$0xff] }
 0x13f   :  { %v779_v10 = vpop.f32.mrf.mxu0  ;;  %v458_v26 = vrot.slane %v457_v23, 4  ;;  %1773 = vmatpush.msrb.mxu2 %v1724_v62 }
 0x140   :  { %v389_v5 = vadd.f32 %v2566_v40, %v369_v55  ;;  %v2775_v45 = vsel %vm1654_vm6, %v970_v63, %v2725_v24  ;;  %v862_v58 = vsel %vm856_vm2, %v849_v47, %v850_v8  ;;  %v804_v24 = vrot.slane %v2756_v17, 1  ;;  %1761 = vmatpush.msrb.mxu1 %v1700_v51 }
 0x141   :  { %v2769_v33 = vpop.f32.mrf.mxu2  ;;  %v803_v55 = vrot.slane %v2733_v14, 1  ;;  %v882_v1 = vadd.f32 %v862_v58, %v833_v54  ;;  %v851_v0 = vrot.slane %v779_v10, 2  ;;  %v459_v7 = vmax.f32 %v457_v23, %v458_v26  ;;  %1774 = vmatpush.msrb.mxu2 %v1723_v37  ;;  %v1698_v10 = vld [vmem:[#allocation10 + $0x8] sm:$0xff] }
 0x142   :  { %v405_v32 = vmax.f32 %v389_v5, 0.0  ;;  %v315_v56 = vpop.f32.mrf.mxu1  ;;  %v881_v5 = vadd.f32 %v863_v61, %v832_v44  ;;  %1762 = vmatpush.msrb.mxu1 %v1699_v48 }
 0x143   :  { %v336_v59 = vrot.slane %v315_v56, 1  ;;  %v811_v14 = vsel %vm341_vm0, %v803_v55, %v804_v24  ;;  %v812_v49 = vsel %vm341_vm0, %v802_v34, %v803_v55  ;;  %v902_v30 = vadd.f32 %v2598_v31, %v882_v1  ;;  %1775 = vmatpush.msrb.mxu2 %v1722_v57  ;;  %v1721_v34 = vld [vmem:[#allocation10 + $0xc0] sm:$0xff] }
 0x144   :  { %v424_v38 = vsel %vm412_vm1, %v405_v32, -inf  ;;  %v835_v50 = vadd.f32 %v811_v14, %v2737_v52  ;;  %v901_v43 = vadd.f32 %v2598_v31, %v881_v5  ;;  %v861_v19 = vsel %vm856_vm2, %v850_v8, %v851_v0  ;;  %v1720_v8 = vld [vmem:[#allocation10 + $0xb8] sm:$0xff]  ;;  %1763 = vmatpush.msrb.mxu1 %v1698_v10 }
 0x145   :  { %v464_v2 = vmax.f32 %v404_v29, %v424_v38  ;;  %v344_v6 = vsel %vm341_vm0, %v335_v25, %v336_v59  ;;  %v834_v52 = vadd.f32 %v812_v49, %v2716_v28  ;;  %v918_v54 = vmax.f32 %v902_v30, 0.0  ;;  %1776 = vmatpush.msrb.mxu2 %v1721_v34  ;;  %v1719_v29 = vld [vmem:[#allocation10 + $0xb0] sm:$0xff] }
 0x146   :  { %v2794_v13 = vpop.f32.mrf.mxu3  ;;  %v370_v47 = vadd.f32 %v344_v6, %v2526_v12  ;;  %1764 = vmatpush.msrb.mxu1 %v1697_v3  ;;  %v917_v55 = vmax.f32 %v901_v43, 0.0  ;;  %v1718_v6 = vld [vmem:[#allocation10 + $0xa8] sm:$0xff]  ;;  %v1716_v43 = vld [vmem:[#allocation10 + $0x98] sm:$0xff] }
 0x147   :  { %v2811_v63 = vpop.f32.mrf.mxu0  ;;  %v465_v23 = vrot.slane %v464_v2, 4  ;;  %v883_v26 = vadd.f32 %v861_v19, %v834_v52  ;;  %1777 = vmatpush.msrb.mxu2 %v1720_v8  ;;  %v805_v51 = vrot.slane %v2794_v13, 1  ;;  %v1717_v13 = vld [vmem:[#allocation10 + $0xa0] sm:$0xff]  ;;  %v1715_v52 = vld [vmem:[#allocation10 + $0x90] sm:$0xff] }
 0x148   :  { %v852_v56 = vrot.slane %v2811_v63, 2  ;;  %v390_v38 = vadd.f32 %v2566_v40, %v370_v47 }
 0x149   :  { %v2805_v4 = vpop.f32.mrf.mxu2  ;;  %1778 = vmatpush.msrb.mxu2 %v1719_v29  ;;  %v903_v49 = vadd.f32 %v2598_v31, %v883_v26  ;;  %v1713_v29 = vld [vmem:[#allocation10 + $0x80] sm:$0xff] }
 0x14a   :  { %v318_v25 = vpop.f32.mrf.mxu1  ;;  %v860_v36 = vsel %vm856_vm2, %v851_v0, %v852_v56  ;;  %1376 = vmatmul.bf16.gmra.mxu0 %v2473_v42  ;;  %v466_v42 = vmax.f32 %v464_v2, %v465_v23  ;;  %v406_v2 = vmax.f32 %v390_v38, 0.0  ;;  %v936_v0 = vsel %vm926_vm3, %v918_v54, -inf }
 0x14b   :  { %v337_v32 = vrot.slane %v318_v25, 1  ;;  %1332 = vmatmul.bf16.gmra.mxu3 %v2463_v53  ;;  %v884_v11 = vadd.f32 %v860_v36, %v835_v50  ;;  %1779 = vmatpush.msrb.mxu2 %v1718_v6  ;;  %v810_v23 = vsel %vm341_vm0, %v804_v24, %v805_v51  ;;  %v919_v36 = vmax.f32 %v903_v49, 0.0 }
 0x14c   :  { %v467_v14 = vrot.slane %v466_v42, 2 }
 0x14d   :  { %v343_v12 = vsel %vm341_vm0, %v336_v59, %v337_v32  ;;  %1234 = vmatmul.bf16.gmra.mxu1 %v2463_v53  ;;  %v460_v59 = vrot.slane %v459_v7, 2  ;;  %1780 = vmatpush.msrb.mxu2 %v1717_v13 }
 0x14e   :  { %v371_v58 = vadd.f32 %v343_v12, %v2534_v16  ;;  %v2832_v35 = vpop.f32.mrf.mxu3  ;;  %1283 = vmatmul.bf16.gmra.mxu2 %v2463_v53  ;;  %v904_v16 = vadd.f32 %v2598_v31, %v884_v11  ;;  %v971_v12 = vmax.f32 %v917_v55, %v936_v0 }
 0x14f   :  { %v2842_v1 = vpop.f32.mrf.mxu0  ;;  %v461_v48 = vmax.f32 %v459_v7, %v460_v59  ;;  %v806_v50 = vrot.slane %v2832_v35, 1  ;;  %1781 = vmatpush.msrb.mxu2 %v1716_v43 }
 0x150   :  { %v391_v28 = vadd.f32 %v2566_v40, %v371_v58  ;;  %v920_v37 = vmax.f32 %v904_v16, 0.0  ;;  %v853_v47 = vrot.slane %v2842_v1, 2  ;;  %v468_v58 = vmax.f32 %v466_v42, %v467_v14  ;;  %v1714_v42 = vld [vmem:[#allocation10 + $0x88] sm:$0xff] }
 0x151   :  { %v2839_v61 = vpop.f32.mrf.mxu2  ;;  %v462_v18 = vrot.slane %v461_v48, 1  ;;  %v809_v8 = vsel %vm341_vm0, %v805_v51, %v806_v50  ;;  %1782 = vmatpush.msrb.mxu2 %v1715_v52 }
 0x152   :  { %v407_v62 = vmax.f32 %v391_v28, 0.0  ;;  %v320_v44 = vpop.f32.mrf.mxu1  ;;  %v837_v55 = vadd.f32 %v809_v8, %v2805_v4 }
 0x153   :  { %v338_v5 = vrot.slane %v320_v44, 1  ;;  %1783 = vmatpush.msrb.mxu2 %v1714_v42  ;;  %v972_v44 = vrot.slane %v971_v12, 4 }
 0x154   :  { %v426_v25 = vsel %vm412_vm1, %v407_v62, -inf }
 0x155   :  { %v471_v57 = vmax.f32 %v406_v2, %v426_v25  ;;  %v342_v30 = vsel %vm341_vm0, %v337_v32, %v338_v5  ;;  %v357_v7 = vsel %vm341_vm0, %v338_v5, %v323_v22  ;;  %v938_v22 = vsel %vm926_vm3, %v920_v37, -inf  ;;  %1784 = vmatpush.msrb.mxu2 %v1713_v29 }
 0x156   :  { %v372_v10 = vadd.f32 %v342_v30, %v2516_v9  ;;  %v373_v34 = vadd.f32 %v357_v7, %v2532_v15  ;;  %v740_v32 = vpop.f32.mrf.mxu3  ;;  %v836_v9 = vadd.f32 %v810_v23, %v2769_v33  ;;  %v859_v15 = vsel %vm856_vm2, %v852_v56, %v853_v47 }
 0x157   :  { %v472_v19 = vrot.slane %v471_v57, 4  ;;  %v978_v3 = vmax.f32 %v919_v36, %v938_v22  ;;  %v787_v38 = vpop.f32.mrf.mxu0  ;;  %v463_v33 = vmax.f32 %v461_v48, %v462_v18  ;;  %v807_v56 = vrot.slane %v740_v32, 1 }
 0x158   :  { %v392_v17 = vadd.f32 %v2566_v40, %v372_v10  ;;  %v393_v24 = vadd.f32 %v2566_v40, %v373_v34  ;;  %v885_v28 = vadd.f32 %v859_v15, %v836_v9  ;;  %v854_v16 = vrot.slane %v787_v38, 2 }
 0x159   :  { %v473_v11 = vmax.f32 %v471_v57, %v472_v19  ;;  %v691_v35 = vpop.f32.mrf.mxu2  ;;  %v979_v1 = vrot.slane %v978_v3, 4  ;;  %v469_v2 = vrot.slane %v468_v58, 1  ;;  %v808_v4 = vsel %vm341_vm0, %v806_v50, %v807_v56 }
 0x15a   :  { %v408_v59 = vmax.f32 %v392_v17, 0.0  ;;  %v409_v54 = vmax.f32 %v393_v24, 0.0  ;;  %v2874_v40 = vpop.f32.mrf.mxu1  ;;  %1381 = vmatmul.bf16.gmra.mxu0 %v2463_v53  ;;  %v858_v6 = vsel %vm856_vm2, %v853_v47, %v854_v16  ;;  %v905_v14 = vadd.f32 %v2598_v31, %v885_v28 }
 0x15b   :  { %v474_v26 = vrot.slane %v473_v11, 2  ;;  %v886_v5 = vadd.f32 %v858_v6, %v837_v55  ;;  %v823_v49 = vsel %vm341_vm0, %v807_v56, %v792_v27  ;;  %v1657_v57 = vsel %vm1656_vm7, %v463_v33, %v2722_v41 }
 0x15c   :  { %v428_v63 = vsel %vm412_vm1, %v409_v54, -inf  ;;  %v973_v30 = vmax.f32 %v971_v12, %v972_v44  ;;  %v980_v7 = vmax.f32 %v978_v3, %v979_v1  ;;  %v470_v50 = vmax.f32 %v468_v58, %v469_v2 }
 0x15d   :  { %v478_v62 = vmax.f32 %v408_v59, %v428_v63  ;;  %v475_v51 = vmax.f32 %v473_v11, %v474_v26  ;;  %v906_v25 = vadd.f32 %v2598_v31, %v886_v5  ;;  %v838_v10 = vadd.f32 %v808_v4, %v2839_v61 }
 0x15e   :  { %v2882_v48 = vpop.f32.mrf.mxu3  ;;  %v921_v27 = vmax.f32 %v905_v14, 0.0  ;;  %v839_v43 = vadd.f32 %v823_v49, %v691_v35  ;;  %v974_v36 = vrot.slane %v973_v30, 2  ;;  %v1659_v15 = vsel %vm1658_vm8, %v470_v50, %v1657_v57 }
 0x15f   :  { %v479_v37 = vrot.slane %v478_v62, 4  ;;  %v476_v53 = vrot.slane %v475_v51, 1  ;;  %v789_v47 = vpop.f32.mrf.mxu0  ;;  %v922_v20 = vmax.f32 %v906_v25, 0.0  ;;  %v1435_v18 = vrot.slane %v2882_v48, 2 }
 0x160   :  { %v855_v34 = vrot.slane %v789_v47, 2  ;;  %v981_v35 = vrot.slane %v980_v7, 2  ;;  %v975_v29 = vmax.f32 %v973_v30, %v974_v36  ;;  %v1744_v30 = vld [vmem:[#allocation10 + $0x178] sm:$0xff]  ;;  %v1743_v47 = vld [vmem:[#allocation10 + $0x170] sm:$0xff] }
 0x161   :  { %v480_v0 = vmax.f32 %v478_v62, %v479_v37  ;;  %v2892_v13 = vpop.f32.mrf.mxu2  ;;  %v477_v19 = vmax.f32 %v475_v51, %v476_v53  ;;  %v940_v41 = vsel %vm926_vm3, %v922_v20, -inf  ;;  %1789 = vmatpush.msrb.mxu3 %v1744_v30 }
 0x162   :  { %v2896_v23 = vpop.f32.mrf.mxu1  ;;  %v857_v22 = vsel %vm856_vm2, %v854_v16, %v855_v34  ;;  %v872_v12 = vsel %vm856_vm2, %v855_v34, %v840_v60  ;;  %v985_v17 = vmax.f32 %v921_v27, %v940_v41  ;;  %v1387_v59 = vrot.slane %v2892_v13, 1 }
 0x163   :  { %v481_v32 = vrot.slane %v480_v0, 2  ;;  %v887_v24 = vadd.f32 %v857_v22, %v838_v10  ;;  %v888_v52 = vadd.f32 %v872_v12, %v839_v43  ;;  %v1661_v42 = vsel %vm1660_vm9, %v477_v19, %v1659_v15  ;;  %1790 = vmatpush.msrb.mxu3 %v1743_v47 }
 0x164   :  { %v986_v3 = vrot.slane %v985_v17, 4  ;;  %v982_v44 = vmax.f32 %v980_v7, %v981_v35  ;;  %v976_v53 = vrot.slane %v975_v29, 1 }
 0x165   :  { %v482_v61 = vmax.f32 %v480_v0, %v481_v32  ;;  %v907_v8 = vadd.f32 %v2598_v31, %v887_v24  ;;  %v908_v39 = vadd.f32 %v2598_v31, %v888_v52 }
 0x166   :  { %v1300_v58 = vpop.f32.mrf.mxu3  ;;  %v987_v26 = vmax.f32 %v985_v17, %v986_v3  ;;  %v983_v57 = vrot.slane %v982_v44, 1  ;;  %v977_v43 = vmax.f32 %v975_v29, %v976_v53 }
 0x167   :  { %v1436_v9 = vrot.slane %v1300_v58, 2  ;;  %v483_v11 = vrot.slane %v482_v61, 1  ;;  %v923_v33 = vmax.f32 %v907_v8, 0.0  ;;  %v924_v63 = vmax.f32 %v908_v39, 0.0  ;;  %v2917_v56 = vpop.f32.mrf.mxu0 }
 0x168   :  { %v988_v55 = vrot.slane %v987_v26, 2  ;;  %v1483_v20 = vrot.slane %v2917_v56, 3  ;;  %v984_v22 = vmax.f32 %v982_v44, %v983_v57 }
 0x169   :  { %v1465_v60 = vsel %vm856_vm2, %v1435_v18, %v1436_v9  ;;  %v1251_v54 = vpop.f32.mrf.mxu2  ;;  %v484_v38 = vmax.f32 %v482_v61, %v483_v11  ;;  %v942_v62 = vsel %vm926_vm3, %v924_v63, -inf }
 0x16a   :  { %v1388_v28 = vrot.slane %v1251_v54, 1  ;;  %v1205_v16 = vpop.f32.mrf.mxu1  ;;  %v992_v1 = vmax.f32 %v923_v33, %v942_v62  ;;  %v989_v37 = vmax.f32 %v987_v26, %v988_v55  ;;  %v2947_v54 = vld [vmem:[%s3105_s4 + $0x2] ss:$0 sm:$0xff] }
 0x16b   :  { %v1663_v31 = vsel %vm1662_vm10, %v484_v38, %v1661_v42 }
 0x16c   :  { %v1417_v51 = vsel %vm341_vm0, %v1387_v59, %v1388_v28  ;;  %1765 = vmatmul.f32.vlgmr.msrb.gmra.mxu1 %v1663_v31  ;;  %v993_v5 = vrot.slane %v992_v1, 4 }
 0x16d   :  { %v1419_v6 = vadd.f32 %v1417_v51, %v2874_v40  ;;  %v990_v40 = vrot.slane %v989_v37, 1 }
 0x16e   :  { %v1303_v2 = vpop.f32.mrf.mxu3  ;;  %v994_v0 = vmax.f32 %v992_v1, %v993_v5  ;;  %v1742_v1 = vld [vmem:[#allocation10 + $0x168] sm:$0xff] }
 0x16f   :  { %v1437_v14 = vrot.slane %v1303_v2, 2  ;;  %v1467_v4 = vadd.f32 %v1465_v60, %v1419_v6  ;;  %v1349_v50 = vpop.f32.mrf.mxu0  ;;  %v991_v17 = vmax.f32 %v989_v37, %v990_v40  ;;  %v1741_v6 = vld [vmem:[#allocation10 + $0x160] sm:$0xff]  ;;  %1791 = vmatpush.msrb.mxu3 %v1742_v1 }
 0x170   :  { %v1484_v34 = vrot.slane %v1349_v50, 3  ;;  %v995_v32 = vrot.slane %v994_v0, 2 }
 0x171   :  { %v1464_v49 = vsel %vm856_vm2, %v1436_v9, %v1437_v14  ;;  %v1254_v25 = vpop.f32.mrf.mxu2  ;;  %v1676_v9 = vsel %vm1656_vm7, %v977_v43, %v2775_v45  ;;  %1792 = vmatpush.msrb.mxu3 %v1741_v6 }
 0x172   :  { %v1389_v7 = vrot.slane %v1254_v25, 1  ;;  %v1207_v10 = vpop.f32.mrf.mxu1  ;;  %v1514_v41 = vsel %vm1499_vm11, %v1483_v20, %v1484_v34  ;;  %v996_v12 = vmax.f32 %v994_v0, %v995_v32  ;;  %v1677_v35 = vsel %vm1658_vm8, %v984_v22, %v1676_v9 }
 0x173   :  { %v1516_v61 = vadd.f32 %v1514_v41, %v1467_v4  ;;  %v1678_v39 = vsel %vm1660_vm9, %v991_v17, %v1677_v35  ;;  %v1739_v35 = vld [vmem:[#allocation10 + $0x150] sm:$0xff] }
 0x174   :  { %v1416_v27 = vsel %vm341_vm0, %v1388_v28, %v1389_v7  ;;  %v997_v58 = vrot.slane %v996_v12, 1 }
 0x175   :  { %v1420_v19 = vadd.f32 %v1416_v27, %v2896_v23  ;;  %v1536_v31 = vadd.f32 %v2947_v54, %v1516_v61 }
 0x176   :  { %v1305_v36 = vpop.f32.mrf.mxu3  ;;  %v998_v15 = vmax.f32 %v996_v12, %v997_v58 }
 0x177   :  { %v1438_v24 = vrot.slane %v1305_v36, 2  ;;  %v1468_v52 = vadd.f32 %v1464_v49, %v1420_v19  ;;  %v1352_v8 = vpop.f32.mrf.mxu0 }
 0x178   :  { %v1485_v38 = vrot.slane %v1352_v8, 3  ;;  %v1679_v45 = vsel %vm1662_vm10, %v998_v15, %v1678_v39  ;;  %v1740_v15 = vld [vmem:[#allocation10 + $0x158] sm:$0xff] }
 0x179   :  { %v1463_v11 = vsel %vm856_vm2, %v1437_v14, %v1438_v24  ;;  %v1256_v23 = vpop.f32.mrf.mxu2  ;;  %1785 = vmatmul.f32.vlgmr.msrb.gmra.mxu2 %v1679_v45  ;;  %v1552_v14 = vmax.f32 %v1536_v31, 0.0  ;;  %1793 = vmatpush.msrb.mxu3 %v1740_v15 }
 0x17a   :  { %v1390_v3 = vrot.slane %v1256_v23, 1  ;;  %v1210_v60 = vpop.f32.mrf.mxu1  ;;  %v1513_v33 = vsel %vm1499_vm11, %v1484_v34, %v1485_v38 }
 0x17b   :  { %v1517_v63 = vadd.f32 %v1513_v33, %v1468_v52  ;;  %1794 = vmatpush.msrb.mxu3 %v1739_v35 }
 0x17c   :  { %v1415_v42 = vsel %vm341_vm0, %v1389_v7, %v1390_v3 }
 0x17d   :  { %v1421_v26 = vadd.f32 %v1415_v42, %v1205_v16  ;;  %v1537_v62 = vadd.f32 %v2947_v54, %v1517_v63 }
 0x17e   :  { %v1308_v28 = vpop.f32.mrf.mxu3 }
 0x17f   :  { %v1439_v29 = vrot.slane %v1308_v28, 2  ;;  %v1469_v55 = vadd.f32 %v1463_v11, %v1421_v26  ;;  %v1553_v16 = vmax.f32 %v1537_v62, 0.0  ;;  %v1354_v37 = vpop.f32.mrf.mxu0 }
 0x180   :  { %v1486_v4 = vrot.slane %v1354_v37, 3 }
 0x181   :  { %v1462_v51 = vsel %vm856_vm2, %v1438_v24, %v1439_v29  ;;  %v1259_v44 = vpop.f32.mrf.mxu2  ;;  %v1571_v53 = vsel %vm1569_vm12, %v1553_v16, -inf }
 0x182   :  { %v1391_v2 = vrot.slane %v1259_v44, 1  ;;  %v1212_v5 = vpop.f32.mrf.mxu1  ;;  %v1586_v49 = vmax.f32 %v1552_v14, %v1571_v53  ;;  %v1512_v57 = vsel %vm1499_vm11, %v1485_v38, %v1486_v4 }
 0x183   :  { %v1518_v30 = vadd.f32 %v1512_v57, %v1469_v55 }
 0x184   :  { %v1414_v0 = vsel %vm341_vm0, %v1390_v3, %v1391_v2  ;;  %v1587_v22 = vrot.slane %v1586_v49, 4 }
 0x185   :  { %v1422_v25 = vadd.f32 %v1414_v0, %v1207_v10  ;;  %v1538_v17 = vadd.f32 %v2947_v54, %v1518_v30 }
 0x186   :  { %v1310_v47 = vpop.f32.mrf.mxu3  ;;  %v1588_v9 = vmax.f32 %v1586_v49, %v1587_v22  ;;  %v1738_v22 = vld [vmem:[#allocation10 + $0x148] sm:$0xff] }
 0x187   :  { %v1440_v7 = vrot.slane %v1310_v47, 2  ;;  %v1470_v50 = vadd.f32 %v1462_v51, %v1422_v25  ;;  %v1357_v27 = vpop.f32.mrf.mxu0  ;;  %1795 = vmatpush.msrb.mxu3 %v1738_v22 }
 0x188   :  { %v1487_v43 = vrot.slane %v1357_v27, 3  ;;  %v1589_v33 = vrot.slane %v1588_v9, 2 }
 0x189   :  { %v1461_v40 = vsel %vm856_vm2, %v1439_v29, %v1440_v7  ;;  %v1261_v34 = vpop.f32.mrf.mxu2 }
 0x18a   :  { %v1392_v32 = vrot.slane %v1261_v34, 1  ;;  %v1215_v19 = vpop.f32.mrf.mxu1  ;;  %v1511_v12 = vsel %vm1499_vm11, %v1486_v4, %v1487_v43  ;;  %v1590_v44 = vmax.f32 %v1588_v9, %v1589_v33 }
 0x18b   :  { %v1519_v61 = vadd.f32 %v1511_v12, %v1470_v50 }
 0x18c   :  { %v1413_v41 = vsel %vm341_vm0, %v1391_v2, %v1392_v32  ;;  %v1591_v0 = vrot.slane %v1590_v44, 1 }
 0x18d   :  { %v1423_v10 = vadd.f32 %v1413_v41, %v1210_v60  ;;  %v1539_v58 = vadd.f32 %v2947_v54, %v1519_v61  ;;  %v1554_v60 = vmax.f32 %v1538_v17, 0.0 }
 0x18e   :  { %v1313_v36 = vpop.f32.mrf.mxu3  ;;  %v1592_v27 = vmax.f32 %v1590_v44, %v1591_v0 }
 0x18f   :  { %v1441_v24 = vrot.slane %v1313_v36, 2  ;;  %v1471_v52 = vadd.f32 %v1461_v40, %v1423_v10  ;;  %v1555_v3 = vmax.f32 %v1539_v58, 0.0  ;;  %v1359_v39 = vpop.f32.mrf.mxu0 }
 0x190   :  { %v1488_v38 = vrot.slane %v1359_v39, 3 }
 0x191   :  { %v1460_v11 = vsel %vm856_vm2, %v1440_v7, %v1441_v24  ;;  %v1264_v23 = vpop.f32.mrf.mxu2  ;;  %v1573_v42 = vsel %vm1569_vm12, %v1555_v3, -inf }
 0x192   :  { %v1393_v8 = vrot.slane %v1264_v23, 1  ;;  %v1217_v45 = vpop.f32.mrf.mxu1  ;;  %v1593_v63 = vmax.f32 %v1554_v60, %v1573_v42  ;;  %v1510_v31 = vsel %vm1499_vm11, %v1487_v43, %v1488_v38 }
 0x193   :  { %v1520_v29 = vadd.f32 %v1510_v31, %v1471_v52 }
 0x194   :  { %v1412_v26 = vsel %vm341_vm0, %v1392_v32, %v1393_v8  ;;  %v1594_v62 = vrot.slane %v1593_v63, 4 }
 0x195   :  { %v1424_v28 = vadd.f32 %v1412_v26, %v1212_v5  ;;  %v1540_v40 = vadd.f32 %v2947_v54, %v1520_v29 }
 0x196   :  { %v1315_v55 = vpop.f32.mrf.mxu3  ;;  %v1595_v1 = vmax.f32 %v1593_v63, %v1594_v62 }
 0x197   :  { %v1472_v51 = vadd.f32 %v1460_v11, %v1424_v28  ;;  %v1442_v16 = vrot.slane %v1315_v55, 2  ;;  %v1362_v37 = vpop.f32.mrf.mxu0  ;;  %v1556_v36 = vmax.f32 %v1540_v40, 0.0 }
 0x198   :  { %v1596_v14 = vrot.slane %v1595_v1, 2  ;;  %v1489_v4 = vrot.slane %v1362_v37, 3 }
 0x199   :  { %v1266_v6 = vpop.f32.mrf.mxu2  ;;  %v1459_v30 = vsel %vm856_vm2, %v1441_v24, %v1442_v16 }
 0x19a   :  { %v1394_v2 = vrot.slane %v1266_v6, 1  ;;  %v2981_v53 = vpop.f32.mrf.mxu1  ;;  %v1597_v49 = vmax.f32 %v1595_v1, %v1596_v14  ;;  %v1509_v57 = vsel %vm1499_vm11, %v1488_v38, %v1489_v4  ;;  %v1736_v6 = vld [vmem:[#allocation10 + $0x138] sm:$0xff] }
 0x19b   :  { %v1521_v47 = vadd.f32 %v1509_v57, %v1472_v51 }
 0x19c   :  { %v1411_v5 = vsel %vm341_vm0, %v1393_v8, %v1394_v2  ;;  %v1598_v50 = vrot.slane %v1597_v49, 1 }
 0x19d   :  { %v1425_v25 = vadd.f32 %v1411_v5, %v1215_v19  ;;  %v1541_v32 = vadd.f32 %v2947_v54, %v1521_v47  ;;  %v1737_v19 = vld [vmem:[#allocation10 + $0x140] sm:$0xff] }
 0x19e   :  { %v2989_v7 = vpop.f32.mrf.mxu3  ;;  %v1599_v43 = vmax.f32 %v1597_v49, %v1598_v50  ;;  %1796 = vmatpush.msrb.mxu3 %v1737_v19 }
 0x19f   :  { %v1473_v34 = vadd.f32 %v1459_v30, %v1425_v25  ;;  %v1557_v10 = vmax.f32 %v1541_v32, 0.0  ;;  %v1364_v61 = vpop.f32.mrf.mxu0  ;;  %v1443_v8 = vrot.slane %v2989_v7, 2 }
 0x1a0   :  { %v1490_v17 = vrot.slane %v1364_v61, 3  ;;  %v1689_v52 = vsel %vm1650_vm4, %v1599_v43, %v1592_v27  ;;  %1797 = vmatpush.msrb.mxu3 %v1736_v6 }
 0x1a1   :  { %v1269_v41 = vpop.f32.mrf.mxu2  ;;  %v1575_v58 = vsel %vm1569_vm12, %v1557_v10, -inf  ;;  %v1458_v33 = vsel %vm856_vm2, %v1442_v16, %v1443_v8 }
 0x1a2   :  { %v1395_v12 = vrot.slane %v1269_v41, 1  ;;  %v1222_v24 = vpop.f32.mrf.mxu1  ;;  %v1600_v9 = vmax.f32 %v1556_v36, %v1575_v58  ;;  %v1508_v23 = vsel %vm1499_vm11, %v1489_v4, %v1490_v17 }
 0x1a3   :  { %v1522_v15 = vadd.f32 %v1508_v23, %v1473_v34 }
 0x1a4   :  { %v1410_v11 = vsel %vm341_vm0, %v1394_v2, %v1395_v12  ;;  %v1601_v3 = vrot.slane %v1600_v9, 4  ;;  %v1735_v2 = vld [vmem:[#allocation10 + $0x130] sm:$0xff] }
 0x1a5   :  { %v1426_v39 = vadd.f32 %v1410_v11, %v1217_v45  ;;  %v1542_v1 = vadd.f32 %v2947_v54, %v1522_v15  ;;  %1798 = vmatpush.msrb.mxu3 %v1735_v2 }
 0x1a6   :  { %v1320_v35 = vpop.f32.mrf.mxu3  ;;  %v1602_v60 = vmax.f32 %v1600_v9, %v1601_v3 }
 0x1a7   :  { %v1367_v42 = vpop.f32.mrf.mxu0  ;;  %v1474_v31 = vadd.f32 %v1458_v33, %v1426_v39  ;;  %v1558_v25 = vmax.f32 %v1542_v1, 0.0  ;;  %v1444_v30 = vrot.slane %v1320_v35, 2  ;;  %v1734_v35 = vld [vmem:[#allocation10 + $0x128] sm:$0xff] }
 0x1a8   :  { %v1603_v26 = vrot.slane %v1602_v60, 2  ;;  %v1491_v63 = vrot.slane %v1367_v42, 3  ;;  %1799 = vmatpush.msrb.mxu3 %v1734_v35 }
 0x1a9   :  { %v1271_v38 = vpop.f32.mrf.mxu2  ;;  %v1457_v22 = vsel %vm856_vm2, %v1443_v8, %v1444_v30 }
 0x1aa   :  { %v3003_v28 = vpop.f32.mrf.mxu1  ;;  %v1604_v29 = vmax.f32 %v1602_v60, %v1603_v26  ;;  %v1507_v55 = vsel %vm1499_vm11, %v1490_v17, %v1491_v63  ;;  %v1396_v62 = vrot.slane %v1271_v38, 1 }
 0x1ab   :  { %v1523_v51 = vadd.f32 %v1507_v55, %v1474_v31 }
 0x1ac   :  { %v1605_v45 = vrot.slane %v1604_v29, 1  ;;  %v1409_v4 = vsel %vm341_vm0, %v1395_v12, %v1396_v62 }
 0x1ad   :  { %v1543_v37 = vadd.f32 %v2947_v54, %v1523_v51  ;;  %v1427_v40 = vadd.f32 %v1409_v4, %v2981_v53 }
 0x1ae   :  { %v3007_v44 = vpop.f32.mrf.mxu3  ;;  %v1606_v16 = vmax.f32 %v1604_v29, %v1605_v45 }
 0x1af   :  { %v1559_v5 = vmax.f32 %v1543_v37, 0.0  ;;  %v1369_v49 = vpop.f32.mrf.mxu0  ;;  %v1445_v41 = vrot.slane %v3007_v44, 2  ;;  %v1475_v61 = vadd.f32 %v1457_v22, %v1427_v40 }
 0x1b0   :  { %v1690_v57 = vsel %vm1652_vm5, %v1606_v16, %v1689_v52  ;;  %v1492_v7 = vrot.slane %v1369_v49, 3 }
 0x1b1   :  { %v1274_v14 = vpop.f32.mrf.mxu2  ;;  %v1577_v47 = vsel %vm1569_vm12, %v1559_v5, -inf  ;;  %v1456_v52 = vsel %vm856_vm2, %v1444_v30, %v1445_v41 }
 0x1b2   :  { %v1397_v0 = vrot.slane %v1274_v14, 1  ;;  %v1227_v50 = vpop.f32.mrf.mxu1  ;;  %v1607_v34 = vmax.f32 %v1558_v25, %v1577_v47  ;;  %v1506_v10 = vsel %vm1499_vm11, %v1491_v63, %v1492_v7 }
 0x1b3   :  { %v1524_v58 = vadd.f32 %v1506_v10, %v1475_v61 }
 0x1b4   :  { %v1408_v32 = vsel %vm341_vm0, %v1396_v62, %v1397_v0  ;;  %v1608_v43 = vrot.slane %v1607_v34, 4 }
 0x1b5   :  { %v1428_v19 = vadd.f32 %v1408_v32, %v1222_v24  ;;  %v1733_v24 = vld [vmem:[#allocation10 + $0x120] sm:$0xff]  ;;  %v1544_v42 = vadd.f32 %v2947_v54, %v1524_v58 }
 0x1b6   :  { %v1325_v27 = vpop.f32.mrf.mxu3  ;;  %v1609_v12 = vmax.f32 %v1607_v34, %v1608_v43  ;;  %1800 = vmatpush.msrb.mxu3 %v1733_v24  ;;  %v1732_v43 = vld [vmem:[#allocation10 + $0x118] sm:$0xff]  ;;  %v1731_v24 = vld [vmem:[#allocation10 + $0x110] sm:$0xff] }
 0x1b7   :  { %v1372_v17 = vpop.f32.mrf.mxu0  ;;  %v1476_v11 = vadd.f32 %v1456_v52, %v1428_v19  ;;  %v1560_v51 = vmax.f32 %v1544_v42, 0.0  ;;  %v1446_v45 = vrot.slane %v1325_v27, 2 }
 0x1b8   :  { %v1610_v53 = vrot.slane %v1609_v12, 2  ;;  %v1493_v9 = vrot.slane %v1372_v17, 3  ;;  %1801 = vmatpush.msrb.mxu3 %v1732_v43 }
 0x1b9   :  { %v1276_v36 = vpop.f32.mrf.mxu2 }
 0x1ba   :  { %v1611_v23 = vmax.f32 %v1609_v12, %v1610_v53  ;;  %v1505_v15 = vsel %vm1499_vm11, %v1492_v7, %v1493_v9  ;;  %v1398_v3 = vrot.slane %v1276_v36, 1  ;;  %v1230_v60 = vpop.f32.mrf.mxu1  ;;  %1802 = vmatpush.msrb.mxu3 %v1731_v24 }
 0x1bb   :  { %v1525_v8 = vadd.f32 %v1505_v15, %v1476_v11 }
 0x1bc   :  { %v1612_v38 = vrot.slane %v1611_v23, 1  ;;  %v1407_v31 = vsel %vm341_vm0, %v1397_v0, %v1398_v3  ;;  %v1455_v0 = vsel %vm856_vm2, %v1445_v41, %v1446_v45 }
 0x1bd   :  { %v1545_v26 = vadd.f32 %v2947_v54, %v1525_v8  ;;  %v1429_v2 = vadd.f32 %v1407_v31, %v3003_v28  ;;  %v1729_v31 = vld [vmem:[#allocation10 + $0x100] sm:$0xff] }
 0x1be   :  { %v3028_v39 = vpop.f32.mrf.mxu3  ;;  %v1613_v33 = vmax.f32 %v1611_v23, %v1612_v38 }
 0x1bf   :  { %v1561_v29 = vmax.f32 %v1545_v26, 0.0  ;;  %v1374_v62 = vpop.f32.mrf.mxu0  ;;  %v1447_v5 = vrot.slane %v3028_v39, 2  ;;  %v1477_v47 = vadd.f32 %v1455_v0, %v1429_v2 }
 0x1c0   :  { %v1691_v44 = vsel %vm1654_vm6, %v1613_v33, %v1690_v57  ;;  %v1494_v6 = vrot.slane %v1374_v62, 3 }
 0x1c1   :  { %v1279_v63 = vpop.f32.mrf.mxu2  ;;  %v1579_v1 = vsel %vm1569_vm12, %v1561_v29, -inf  ;;  %v1454_v34 = vsel %vm856_vm2, %v1446_v45, %v1447_v5 }
 0x1c2   :  { %v1399_v55 = vrot.slane %v1279_v63, 1  ;;  %v1614_v37 = vmax.f32 %v1560_v51, %v1579_v1  ;;  %v1504_v25 = vsel %vm1499_vm11, %v1493_v9, %v1494_v6  ;;  %v1232_v57 = vpop.f32.mrf.mxu1 }
 0x1c3   :  { %v1526_v32 = vadd.f32 %v1504_v25, %v1477_v47 }
 0x1c4   :  { %v1406_v16 = vsel %vm341_vm0, %v1398_v3, %v1399_v55  ;;  %v1615_v4 = vrot.slane %v1614_v37, 4  ;;  %v1730_v3 = vld [vmem:[#allocation10 + $0x108] sm:$0xff] }
 0x1c5   :  { %v1430_v49 = vadd.f32 %v1406_v16, %v1227_v50  ;;  %v1546_v36 = vadd.f32 %v2947_v54, %v1526_v32  ;;  %1803 = vmatpush.msrb.mxu3 %v1730_v3 }
 0x1c6   :  { %v1330_v14 = vpop.f32.mrf.mxu3  ;;  %v1616_v30 = vmax.f32 %v1614_v37, %v1615_v4 }
 0x1c7   :  { %v1377_v28 = vpop.f32.mrf.mxu0  ;;  %v1478_v22 = vadd.f32 %v1454_v34, %v1430_v49  ;;  %v1562_v35 = vmax.f32 %v1546_v36, 0.0  ;;  %v1448_v39 = vrot.slane %v1330_v14, 2  ;;  %1804 = vmatpush.msrb.mxu3 %v1729_v31 }
 0x1c8   :  { %v1617_v40 = vrot.slane %v1616_v30, 2  ;;  %v1495_v27 = vrot.slane %v1377_v28, 3 }
 0x1c9   :  { %v1281_v7 = vpop.f32.mrf.mxu2  ;;  %v1453_v51 = vsel %vm856_vm2, %v1447_v5, %v1448_v39 }
 0x1ca   :  { %v1618_v19 = vmax.f32 %v1616_v30, %v1617_v40  ;;  %v1503_v50 = vsel %vm1499_vm11, %v1494_v6, %v1495_v27  ;;  %v1400_v41 = vrot.slane %v1281_v7, 1  ;;  %v1235_v23 = vpop.f32.mrf.mxu1 }
 0x1cb   :  { %v1527_v10 = vadd.f32 %v1503_v50, %v1478_v22 }
 0x1cc   :  { %v1619_v61 = vrot.slane %v1618_v19, 1  ;;  %v1405_v58 = vsel %vm341_vm0, %v1399_v55, %v1400_v41 }
 0x1cd   :  { %v1547_v17 = vadd.f32 %v2947_v54, %v1527_v10  ;;  %v1431_v26 = vadd.f32 %v1405_v58, %v1230_v60 }
 0x1ce   :  { %v1333_v12 = vpop.f32.mrf.mxu3  ;;  %v1620_v52 = vmax.f32 %v1618_v19, %v1619_v61 }
 0x1cf   :  { %v1563_v9 = vmax.f32 %v1547_v17, 0.0  ;;  %v1379_v15 = vpop.f32.mrf.mxu0  ;;  %v1449_v55 = vrot.slane %v1333_v12, 2  ;;  %v1479_v6 = vadd.f32 %v1453_v51, %v1431_v26 }
 0x1d0   :  { %v1692_v8 = vsel %vm1656_vm7, %v1620_v52, %v1691_v44  ;;  %v1496_v42 = vrot.slane %v1379_v15, 3 }
 0x1d1   :  { %v1284_v53 = vpop.f32.mrf.mxu2  ;;  %v1581_v38 = vsel %vm1569_vm12, %v1563_v9, -inf  ;;  %v1452_v4 = vsel %vm856_vm2, %v1448_v39, %v1449_v55 }
 0x1d2   :  { %v1401_v11 = vrot.slane %v1284_v53, 1  ;;  %v1621_v33 = vmax.f32 %v1562_v35, %v1581_v38  ;;  %v1502_v45 = vsel %vm1499_vm11, %v1495_v27, %v1496_v42  ;;  %v1237_v25 = vpop.f32.mrf.mxu1 }
 0x1d3   :  { %v1528_v0 = vadd.f32 %v1502_v45, %v1479_v6 }
 0x1d4   :  { %v1404_v63 = vsel %vm341_vm0, %v1400_v41, %v1401_v11  ;;  %v1622_v29 = vrot.slane %v1621_v33, 4 }
 0x1d5   :  { %v1432_v44 = vadd.f32 %v1404_v63, %v1232_v57  ;;  %v1548_v13 = vadd.f32 %v2947_v54, %v1528_v0 }
 0x1d6   :  { %v1335_v62 = vpop.f32.mrf.mxu3  ;;  %v1623_v1 = vmax.f32 %v1621_v33, %v1622_v29 }
 0x1d7   :  { %v1450_v2 = vrot.slane %v1335_v62, 2  ;;  %v1382_v16 = vpop.f32.mrf.mxu0  ;;  %v1480_v57 = vadd.f32 %v1452_v4, %v1432_v44  ;;  %v1564_v41 = vmax.f32 %v1548_v13, 0.0 }
 0x1d8   :  { %v1624_v14 = vrot.slane %v1623_v1, 2  ;;  %v1497_v49 = vrot.slane %v1382_v16, 3 }
 0x1d9   :  { %v1286_v60 = vpop.f32.mrf.mxu2  ;;  %v1466_v40 = vsel %vm856_vm2, %v1450_v2, %v1435_v18  ;;  %v1451_v10 = vsel %vm856_vm2, %v1449_v55, %v1450_v2 }
 0x1da   :  { %v1402_v37 = vrot.slane %v1286_v60, 1  ;;  %v1625_v30 = vmax.f32 %v1623_v1, %v1624_v14  ;;  %v1501_v28 = vsel %vm1499_vm11, %v1496_v42, %v1497_v49 }
 0x1db   :  { %v1529_v34 = vadd.f32 %v1501_v28, %v1480_v57 }
 0x1dc   :  { %v1418_v5 = vsel %vm341_vm0, %v1402_v37, %v1387_v59  ;;  %v1403_v47 = vsel %vm341_vm0, %v1401_v11, %v1402_v37  ;;  %v1626_v27 = vrot.slane %v1625_v30, 1 }
 0x1dd   :  { %v1434_v7 = vadd.f32 %v1418_v5, %v1237_v25  ;;  %v1433_v59 = vadd.f32 %v1403_v47, %v1235_v23  ;;  %v1549_v43 = vadd.f32 %v2947_v54, %v1529_v34 }
 0x1de   :  { %v1627_v22 = vmax.f32 %v1625_v30, %v1626_v27 }
 0x1df   :  { %v1482_v32 = vadd.f32 %v1466_v40, %v1434_v7  ;;  %v1565_v19 = vmax.f32 %v1549_v43, 0.0  ;;  %v1384_v50 = vpop.f32.mrf.mxu0  ;;  %v1481_v61 = vadd.f32 %v1451_v10, %v1433_v59 }
 0x1e0   :  { %v1498_v12 = vrot.slane %v1384_v50, 3  ;;  %v1693_v48 = vsel %vm1658_vm8, %v1627_v22, %v1692_v8 }
 0x1e1   :  { %v1583_v18 = vsel %vm1569_vm12, %v1565_v19, -inf }
 0x1e2   :  { %v1628_v36 = vmax.f32 %v1564_v41, %v1583_v18  ;;  %v1500_v17 = vsel %vm1499_vm11, %v1497_v49, %v1498_v12  ;;  %v1515_v53 = vsel %vm1499_vm11, %v1498_v12, %v1483_v20 }
 0x1e3   :  { %v1530_v52 = vadd.f32 %v1500_v17, %v1481_v61  ;;  %v1531_v58 = vadd.f32 %v1515_v53, %v1482_v32 }
 0x1e4   :  { %v1629_v9 = vrot.slane %v1628_v36, 4 }
 0x1e5   :  { %v1550_v11 = vadd.f32 %v2947_v54, %v1530_v52  ;;  %v1551_v23 = vadd.f32 %v2947_v54, %v1531_v58 }
 0x1e6   :  { %v1630_v15 = vmax.f32 %v1628_v36, %v1629_v9 }
 0x1e7   :  { %v1566_v35 = vmax.f32 %v1550_v11, 0.0  ;;  %v1567_v24 = vmax.f32 %v1551_v23, 0.0 }
 0x1e8   :  { %v1631_v3 = vrot.slane %v1630_v15, 2 }
 0x1e9   :  { %v1585_v8 = vsel %vm1569_vm12, %v1567_v24, -inf  ;;  %v1766_v55 = vpop.f32.mrf.mxu1 }
 0x1ea   :  { %v1635_v39 = vmax.f32 %v1566_v35, %v1585_v8  ;;  %v1632_v38 = vmax.f32 %v1630_v15, %v1631_v3  ;;  %v1767_v51 = vadd.f32 %v2228_v46, %v1766_v55 }
 0x1ec   :  { %v1636_v56 = vrot.slane %v1635_v39, 4  ;;  %v1633_v42 = vrot.slane %v1632_v38, 1 }
 0x1ee   :  { %v1637_v21 = vmax.f32 %v1635_v39, %v1636_v56  ;;  %v1634_v20 = vmax.f32 %v1632_v38, %v1633_v42 }
 0x1f0   :  { %v1638_v26 = vrot.slane %v1637_v21, 2  ;;  %v1694_v33 = vsel %vm1660_vm9, %v1634_v20, %v1693_v48 }
 0x1f2   :  { %v1639_v63 = vmax.f32 %v1637_v21, %v1638_v26 }
 0x1f4   :  { %v1640_v31 = vrot.slane %v1639_v63, 1 }
 0x1f6   :  { %v1641_v29 = vmax.f32 %v1639_v63, %v1640_v31 }
 0x1f8   :  { %v1695_v54 = vsel %vm1662_vm10, %v1641_v29, %v1694_v33 }
 0x1f9   :  { %1805 = vmatmul.f32.vlgmr.msrb.gmra.mxu3 %v1695_v54 }
 0x1fc   :  { %v1786_v62 = vpop.f32.mrf.mxu2 }
 0x1fd   :  { %v1787_v44 = vadd.f32 %v1786_v62, %v1767_v51 }
 0x27c   :  { %v1806_v45 = vpop.f32.mrf.mxu3 }
 0x27d   :  { %v1807_v1 = vadd.f32 %v1806_v45, %v1787_v44 }
 0x27f   :  { %1809 = vst [vmem:[#allocation11] sm:$0xff] %v1807_v1 }
 0x280   :  { %1820 = dma.vmem_to_hbm [thread:$0]  %s1816_s12, 128, %s1818_s14, [#allocation4]  }
 0x281   :  { %2379 = dma.done.wait [#allocation4], 128  }
 0x282   :  { %2380 = vsyncadd [#allocation4], 4294967168 }
 0x283   :  { %1825 = vsyncpa [#allocation3], 1 }
 0x284   :  { %1826 = vsyncpa [#allocation6], 1 }
 0x285   :  { %1827 = vsyncpa [#allocation9], 1 }
 0x286   :  { %1828 = vsyncpa [#allocation4], 1 }

</bundles_post_ra>
